<compile_context>
chip_gen: v6e
topology: v6e:2x2x1
jax: 0.10.0
libtpu: 0.0.40
codegen_flags: <defaults>
</compile_context>

<pallas_src>
import jax
import jax.numpy as jnp
from jax import lax
from jax.experimental import pallas as pl
from jax.experimental.pallas import tpu as pltpu

# --- config matching HyperNet.__init__ / AdapterWrapper ---
ENCODING_DIM = 235                 # self.encoding_dim
FEAT_DIM = ENCODING_DIM + 1        # 236 (linguistic attestation vector dim)
PAD_FEAT = 256                     # lane-aligned padded feature dim
HIDDEN_DIM = 8                     # HyperNet.hidden_dim
OUTPUT_DIM = 768                   # HyperNet.output_dim (hard-coded)
INPUT_DIM = 768                    # adapter input dim (model hidden size)
EMBEDDING_DIM = 16                 # adapter bottleneck dim
BATCH, SEQ = 2, 8

# contract last dims of both operands: A (m,k) , B (n,k) -> A @ B^T (m,n)
_NT_DIMS = (((1,), (1,)), ((), ()))


def _round_up(n, m):
    return ((n + m - 1) // m) * m


def _pick_tm(n):
    # Fixed large row tile (near HBM roofline); ragged last block is masked by Pallas.
    # Capped at 512 so f32 x/out double-buffers fit v5e's 16 MiB default scoped VMEM.
    return min(512, max(8, _round_up(n, 8)))


# ---------------- fused kernel: hypernet generation + adapter application ----------------
def _fused_adapter_kernel(d_ref, wp_ref, bp_ref, w3_ref, b2_ref, x_ref, o_ref):
    # ---- HyperNet stage 1: one fused (1,256)@(256,16) matmul for both hypernets ----
    d = d_ref[...]                                                       # (1, 256) f32
    h = jnp.maximum(
        jnp.dot(d, wp_ref[...], preferred_element_type=jnp.float32) + bp_ref[...], 0.0)
    # TODO(synk): nonlinearity between the HyperParamNet linears inferred as ReLU.

    # ---- HyperNet stage 2: expand h into [W_down^T ; W_up] with 8 VPU FMAs ----
    # rows 0:16 of the (32,768) slab use h[:, :8] (down), rows 16:32 use h[:, 8:] (up).
    hb = jnp.concatenate(
        [jnp.broadcast_to(h[:, :HIDDEN_DIM], (EMBEDDING_DIM, HIDDEN_DIM)),
         jnp.broadcast_to(h[:, HIDDEN_DIM:], (EMBEDDING_DIM, HIDDEN_DIM))], axis=0)  # (32, 8)
    slab = b2_ref[...].astype(jnp.float32)                               # (32, 768) bias slab
    for k in range(HIDDEN_DIM):                                          # static unroll, VPU only
        slab = slab + hb[:, k:k + 1] * w3_ref[k].astype(jnp.float32)     # bf16 -> f32 per-k
    wd_t = slab[:EMBEDDING_DIM, :].astype(jnp.bfloat16)                  # (16, 768) = W_down^T
    wu = slab[EMBEDDING_DIM:, :].astype(jnp.bfloat16)                    # (16, 768) = W_up (pre-scaled)

    # ---- Adapter: y = x + relu(x @ W_down) @ W_up  (bf16 MXU feeds, f32 acc + residual) ----
    x = x_ref[...]                                                       # (tm, 768) f32
    down = lax.dot_general(x.astype(jnp.bfloat16), wd_t, _NT_DIMS,
                           preferred_element_type=jnp.float32)           # (tm, 16)
    down = jnp.maximum(down, 0.0).astype(jnp.bfloat16)
    up = jnp.dot(down, wu, preferred_element_type=jnp.float32)           # (tm, 768)
    o_ref[...] = (x + up).astype(o_ref.dtype)


def fused_adapter_forward(kp, dialect_padded, x_flat):
    n, _ = x_flat.shape
    tm = _pick_tm(n)
    grid = (pl.cdiv(n, tm),)
    return pl.pallas_call(
        _fused_adapter_kernel,
        out_shape=jax.ShapeDtypeStruct((n, OUTPUT_DIM), jnp.float32),
        grid_spec=pltpu.PrefetchScalarGridSpec(
            num_scalar_prefetch=0,
            grid=grid,
            in_specs=[
                pl.BlockSpec((1, PAD_FEAT), lambda i: (0, 0)),                               # dialect (1,256)
                pl.BlockSpec((PAD_FEAT, 2 * HIDDEN_DIM), lambda i: (0, 0)),                  # W_pre cat (256,16)
                pl.BlockSpec((1, 2 * HIDDEN_DIM), lambda i: (0, 0)),                         # b_pre cat (1,16)
                pl.BlockSpec((HIDDEN_DIM, 2 * EMBEDDING_DIM, OUTPUT_DIM),
                             lambda i: (0, 0, 0)),                                           # w3 cat (8,32,768) bf16
                pl.BlockSpec((2 * EMBEDDING_DIM, OUTPUT_DIM), lambda i: (0, 0)),             # b2 cat (32,768) bf16
                pl.BlockSpec((tm, INPUT_DIM), lambda i: (i, 0)),                             # hidden states
            ],
            out_specs=pl.BlockSpec((tm, OUTPUT_DIM), lambda i: (i, 0)),
        ),
        compiler_params=pltpu.CompilerParams(dimension_semantics=("parallel",)),
    )(dialect_padded, kp["wp"], kp["bp"], kp["w3"], kp["b2"], x_flat)


# ---------------- apply-only kernel (amortized path: dialect reused across calls) ----------------
def _apply_adapter_kernel(wd_ref, wu_ref, x_ref, o_ref):
    x = x_ref[...]
    down = lax.dot_general(x.astype(jnp.bfloat16), wd_ref[...], _NT_DIMS,
                           preferred_element_type=jnp.float32)
    down = jnp.maximum(down, 0.0).astype(jnp.bfloat16)
    up = jnp.dot(down, wu_ref[...], preferred_element_type=jnp.float32)
    o_ref[...] = (x + up).astype(o_ref.dtype)


def apply_adapter_forward(wd_t_bf16, wu_bf16, x_flat):
    n, _ = x_flat.shape
    tm = _pick_tm(n)
    grid = (pl.cdiv(n, tm),)
    return pl.pallas_call(
        _apply_adapter_kernel,
        out_shape=jax.ShapeDtypeStruct((n, OUTPUT_DIM), jnp.float32),
        grid_spec=pltpu.PrefetchScalarGridSpec(
            num_scalar_prefetch=0,
            grid=grid,
            in_specs=[
                pl.BlockSpec((EMBEDDING_DIM, INPUT_DIM), lambda i: (0, 0)),   # W_down^T (16,768) bf16
                pl.BlockSpec((EMBEDDING_DIM, OUTPUT_DIM), lambda i: (0, 0)),  # W_up (16,768) bf16
                pl.BlockSpec((tm, INPUT_DIM), lambda i: (i, 0)),
            ],
            out_specs=pl.BlockSpec((tm, OUTPUT_DIM), lambda i: (i, 0)),
        ),
        compiler_params=pltpu.CompilerParams(dimension_semantics=("parallel",)),
    )(wd_t_bf16, wu_bf16, x_flat)


# ---------------- one-time parameter re-layout (setup-time, outside the hot path) ----------------
def prepare_params(p):
    """Re-layout raw (PyTorch-shaped) HyperNet params into kernel-friendly shapes."""
    inv = jnp.float32(1.0) / jnp.sqrt(jnp.float32(OUTPUT_DIM))   # scale=True folded in here
    # TODO(synk): scale=True interpretation inferred as dividing the full output by sqrt(output_dim).

    def pad_pre(w):  # (8, 236) -> (256, 8), transposed + zero-padded (lane-aligned K)
        wt = w.T
        return jnp.pad(wt, ((0, PAD_FEAT - wt.shape[0]), (0, 0)))

    # stage-1 weights fused for both hypernets: (256, 16) / (1, 16)
    wp = jnp.concatenate([pad_pre(p["w_pre_down"]), pad_pre(p["w_pre_up"])], axis=1)
    bp = jnp.concatenate([p["b_pre_down"], p["b_pre_up"]], axis=1)
    # down_linear: flat index m = i*EMB + j ; generated W_down^T[j, i]
    w3d = p["w_down_lin"].T.reshape(HIDDEN_DIM, INPUT_DIM, EMBEDDING_DIM).transpose(0, 2, 1)
    b2d = p["b_down_lin"].reshape(INPUT_DIM, EMBEDDING_DIM).T                       # (16, 768)
    # up_linear: flat index m = j*OUT + d ; generated W_up[j, d], pre-scaled
    w3u = p["w_up_lin"].T.reshape(HIDDEN_DIM, EMBEDDING_DIM, OUTPUT_DIM) * inv
    b2u = p["b_up_lin"].reshape(EMBEDDING_DIM, OUTPUT_DIM) * inv                    # (16, 768)
    return {
        "wp": wp.astype(jnp.float32),
        "bp": bp.astype(jnp.float32),
        # expansion slabs stored bf16 (half the dominant HBM traffic), widened in-kernel
        "w3": jnp.concatenate([w3d, w3u], axis=1).astype(jnp.bfloat16),             # (8, 32, 768)
        "b2": jnp.concatenate([b2d, b2u], axis=0).astype(jnp.bfloat16),             # (32, 768)
    }


def _pad_dialect(dialect_features):
    if dialect_features.shape[-1] != PAD_FEAT:
        dialect_features = jnp.pad(
            dialect_features, ((0, 0), (0, PAD_FEAT - dialect_features.shape[-1])))
    return dialect_features


def generate_adapter_weights(kp, dialect_features):
    """Amortized path: generate the 96 KB of adapter weights once (tiny; plain JAX)."""
    d = _pad_dialect(dialect_features)
    h = jax.nn.relu(d @ kp["wp"] + kp["bp"])                                        # (1, 16)
    hb = jnp.concatenate(
        [jnp.broadcast_to(h[:, :HIDDEN_DIM], (EMBEDDING_DIM, HIDDEN_DIM)),
         jnp.broadcast_to(h[:, HIDDEN_DIM:], (EMBEDDING_DIM, HIDDEN_DIM))], axis=0)  # (32, 8)
    slab = kp["b2"].astype(jnp.float32) + jnp.einsum(
        "mk,kmr->mr", hb, kp["w3"].astype(jnp.float32))                             # (32, 768)
    return (slab[:EMBEDDING_DIM].astype(jnp.bfloat16),   # W_down^T (16, 768)
            slab[EMBEDDING_DIM:].astype(jnp.bfloat16))   # W_up    (16, 768)


# ---------------- AdapterWrapper.forward (JAX glue + Pallas hot path) ----------------
def adapter_wrapper_forward(kparams, dialect_features, hidden_states, cached_weights=None):
    """Sets dialect features on both hypernets (-> generates adapter weights) and runs the
    adapter path of the (otherwise opaque) model on `hidden_states`.
    If `cached_weights` (from generate_adapter_weights) is supplied, the hypernet slabs are
    not re-read and only the apply kernel runs."""
    b, s, _ = hidden_states.shape
    x_flat = hidden_states.reshape(b * s, INPUT_DIM)
    if cached_weights is None:
        out = fused_adapter_forward(kparams, _pad_dialect(dialect_features), x_flat)
    else:
        wd_t, wu = cached_weights
        out = apply_adapter_forward(wd_t, wu, x_flat)
    return out.reshape(b, s, OUTPUT_DIM)


# ---------------- pure-JAX reference (for correctness check only) ----------------
def reference_forward(p, dialect_features, hidden_states):
    d = dialect_features[:, :FEAT_DIM]
    h_d = jax.nn.relu(d @ p["w_pre_down"].T + p["b_pre_down"])
    w_down = (h_d @ p["w_down_lin"].T + p["b_down_lin"]).reshape(INPUT_DIM, EMBEDDING_DIM)
    h_u = jax.nn.relu(d @ p["w_pre_up"].T + p["b_pre_up"])
    w_up = ((h_u @ p["w_up_lin"].T + p["b_up_lin"]) /
            jnp.sqrt(jnp.float32(OUTPUT_DIM))).reshape(EMBEDDING_DIM, OUTPUT_DIM)
    x = hidden_states.reshape(-1, INPUT_DIM)
    y = x + jax.nn.relu(x @ w_down) @ w_up
    return y.reshape(hidden_states.shape[0], hidden_states.shape[1], OUTPUT_DIM)


if __name__ == "__main__":
    key = jax.random.PRNGKey(0)
    ks = jax.random.split(key, 6)
    # The module inits these weights with std=1e-7 (adapter contribution ~0); use a larger
    # std here so the correctness check actually exercises the generated-weight math.
    std = 0.02

    raw_params = {
        "w_pre_down": jax.random.normal(ks[0], (HIDDEN_DIM, FEAT_DIM), jnp.float32) * std,
        "b_pre_down": jnp.zeros((1, HIDDEN_DIM), jnp.float32),
        "w_down_lin": jax.random.normal(ks[1], (INPUT_DIM * EMBEDDING_DIM, HIDDEN_DIM), jnp.float32) * std,
        "b_down_lin": jnp.zeros((1, INPUT_DIM * EMBEDDING_DIM), jnp.float32),
        "w_pre_up": jax.random.normal(ks[2], (HIDDEN_DIM, FEAT_DIM), jnp.float32) * std,
        "b_pre_up": jnp.zeros((1, HIDDEN_DIM), jnp.float32),
        "w_up_lin": jax.random.normal(ks[3], (EMBEDDING_DIM * OUTPUT_DIM, HIDDEN_DIM), jnp.float32) * std,
        "b_up_lin": jnp.zeros((1, EMBEDDING_DIM * OUTPUT_DIM), jnp.float32),
    }

    # one-time setup: kernel-layout params (transposes / concat / padding / scale folding / bf16)
    kernel_params = prepare_params(raw_params)

    dialect_features = jax.random.normal(ks[4], (1, FEAT_DIM), jnp.float32)
    hidden_states = jax.random.normal(ks[5], (BATCH, SEQ, INPUT_DIM), jnp.float32)

    ref = reference_forward(raw_params, dialect_features, hidden_states)

    # fused path (dialect may change every call)
    fwd = jax.jit(adapter_wrapper_forward)
    out = fwd(kernel_params, dialect_features, hidden_states)
    jax.block_until_ready(out)
    assert out.shape == (BATCH, SEQ, OUTPUT_DIM)
    assert bool(jnp.allclose(out, ref, atol=3e-4, rtol=3e-3)), "fused path mismatch vs reference"

    # amortized path (dialect reused across calls): generate weights once, apply-only kernel
    cached = generate_adapter_weights(kernel_params, dialect_features)
    out2 = adapter_wrapper_forward(kernel_params, dialect_features, hidden_states,
                                   cached_weights=cached)
    jax.block_until_ready(out2)
    assert bool(jnp.allclose(out2, ref, atol=3e-4, rtol=3e-3)), "cached path mismatch vs reference"

    print("KERNEL_OK")
</pallas_src>

<mosaic_0001>
module attributes {stable_mosaic.version = 11 : i64} {
  func.func @_fused_adapter_kernel(%arg0: i32, %arg1: memref<1x256xf32, #tpu.memory_space<vmem>>, %arg2: memref<256x16xf32, #tpu.memory_space<vmem>>, %arg3: memref<1x16xf32, #tpu.memory_space<vmem>>, %arg4: memref<8x32x768xbf16, #tpu.memory_space<vmem>>, %arg5: memref<32x768xbf16, #tpu.memory_space<vmem>>, %arg6: memref<16x768xf32, #tpu.memory_space<vmem>>, %arg7: memref<16x768xf32, #tpu.memory_space<vmem>>) attributes {dimension_semantics = [#tpu.dimension_semantics<parallel>], iteration_bounds = array<i64: 1>, scalar_prefetch = 0 : i64, scratch_operands = 0 : i64, tpu.core_type = #tpu.core_type<tc>, window_params = [{pipeline_mode = #tpu.pipeline_mode<synchronous>, transform_indices = @transform_0, window_bounds = array<i64: 1, 256>}, {pipeline_mode = #tpu.pipeline_mode<synchronous>, transform_indices = @transform_1, window_bounds = array<i64: 256, 16>}, {pipeline_mode = #tpu.pipeline_mode<synchronous>, transform_indices = @transform_2, window_bounds = array<i64: 1, 16>}, {pipeline_mode = #tpu.pipeline_mode<synchronous>, transform_indices = @transform_3, window_bounds = array<i64: 8, 32, 768>}, {pipeline_mode = #tpu.pipeline_mode<synchronous>, transform_indices = @transform_4, window_bounds = array<i64: 32, 768>}, {transform_indices = @transform_5, window_bounds = array<i64: 16, 768>}, {transform_indices = @transform_6, window_bounds = array<i64: 16, 768>}]} {
    %c0 = arith.constant 0 : index
    %c0_0 = arith.constant 0 : index
    %0 = vector.load %arg1[%c0, %c0_0] : memref<1x256xf32, #tpu.memory_space<vmem>>, vector<1x256xf32>
    %c0_1 = arith.constant 0 : index
    %c0_2 = arith.constant 0 : index
    %1 = vector.load %arg2[%c0_1, %c0_2] : memref<256x16xf32, #tpu.memory_space<vmem>>, vector<256x16xf32>
    %cst = arith.constant dense<0.000000e+00> : vector<1x16xf32>
    %2 = tpu.matmul %0, %1, %cst {dimension_numbers = #tpu.dot_dimension_numbers<[1], [0], [0], [1], [0, 0, 1, 1], [], []>} : vector<1x256xf32>, vector<256x16xf32>, vector<1x16xf32> -> vector<1x16xf32>
    %c0_3 = arith.constant 0 : index
    %c0_4 = arith.constant 0 : index
    %3 = vector.load %arg3[%c0_3, %c0_4] : memref<1x16xf32, #tpu.memory_space<vmem>>, vector<1x16xf32>
    %4 = arith.addf %2, %3 : vector<1x16xf32>
    %cst_5 = arith.constant 0.000000e+00 : f32
    %5 = vector.broadcast %cst_5 : f32 to vector<1x16xf32>
    %6 = arith.maximumf %4, %5 : vector<1x16xf32>
    %7 = vector.extract_strided_slice %6 {offsets = [0, 0], sizes = [1, 8], strides = [1, 1]} : vector<1x16xf32> to vector<1x8xf32>
    %8 = vector.shape_cast %7 : vector<1x8xf32> to vector<1x8xf32>
    %9 = vector.broadcast %8 : vector<1x8xf32> to vector<16x8xf32>
    %10 = vector.extract_strided_slice %6 {offsets = [0, 8], sizes = [1, 8], strides = [1, 1]} : vector<1x16xf32> to vector<1x8xf32>
    %11 = vector.shape_cast %10 : vector<1x8xf32> to vector<1x8xf32>
    %12 = vector.broadcast %11 : vector<1x8xf32> to vector<16x8xf32>
    %13 = tpu.concatenate %9, %12 in 0 : vector<16x8xf32>, vector<16x8xf32> -> vector<32x8xf32>
    %c0_6 = arith.constant 0 : index
    %c0_7 = arith.constant 0 : index
    %14 = vector.load %arg5[%c0_6, %c0_7] : memref<32x768xbf16, #tpu.memory_space<vmem>>, vector<32x768xbf16>
    %15 = arith.extf %14 : vector<32x768xbf16> to vector<32x768xf32>
    %16 = vector.extract_strided_slice %13 {offsets = [0, 0], sizes = [32, 1], strides = [1, 1]} : vector<32x8xf32> to vector<32x1xf32>
    %c0_8 = arith.constant 0 : index
    %c0_9 = arith.constant 0 : index
    %c0_10 = arith.constant 0 : index
    %17 = vector.load %arg4[%c0_8, %c0_9, %c0_10] : memref<8x32x768xbf16, #tpu.memory_space<vmem>>, vector<1x32x768xbf16>
    %18 = vector.shape_cast %17 : vector<1x32x768xbf16> to vector<32x768xbf16>
    %19 = arith.extf %18 : vector<32x768xbf16> to vector<32x768xf32>
    %20 = vector.broadcast %16 : vector<32x1xf32> to vector<32x768xf32>
    %21 = arith.mulf %20, %19 : vector<32x768xf32>
    %22 = arith.addf %15, %21 : vector<32x768xf32>
    %23 = vector.extract_strided_slice %13 {offsets = [0, 1], sizes = [32, 1], strides = [1, 1]} : vector<32x8xf32> to vector<32x1xf32>
    %c1 = arith.constant 1 : index
    %c0_11 = arith.constant 0 : index
    %c0_12 = arith.constant 0 : index
    %24 = vector.load %arg4[%c1, %c0_11, %c0_12] : memref<8x32x768xbf16, #tpu.memory_space<vmem>>, vector<1x32x768xbf16>
    %25 = vector.shape_cast %24 : vector<1x32x768xbf16> to vector<32x768xbf16>
    %26 = arith.extf %25 : vector<32x768xbf16> to vector<32x768xf32>
    %27 = vector.broadcast %23 : vector<32x1xf32> to vector<32x768xf32>
    %28 = arith.mulf %27, %26 : vector<32x768xf32>
    %29 = arith.addf %22, %28 : vector<32x768xf32>
    %30 = vector.extract_strided_slice %13 {offsets = [0, 2], sizes = [32, 1], strides = [1, 1]} : vector<32x8xf32> to vector<32x1xf32>
    %c2 = arith.constant 2 : index
    %c0_13 = arith.constant 0 : index
    %c0_14 = arith.constant 0 : index
    %31 = vector.load %arg4[%c2, %c0_13, %c0_14] : memref<8x32x768xbf16, #tpu.memory_space<vmem>>, vector<1x32x768xbf16>
    %32 = vector.shape_cast %31 : vector<1x32x768xbf16> to vector<32x768xbf16>
    %33 = arith.extf %32 : vector<32x768xbf16> to vector<32x768xf32>
    %34 = vector.broadcast %30 : vector<32x1xf32> to vector<32x768xf32>
    %35 = arith.mulf %34, %33 : vector<32x768xf32>
    %36 = arith.addf %29, %35 : vector<32x768xf32>
    %37 = vector.extract_strided_slice %13 {offsets = [0, 3], sizes = [32, 1], strides = [1, 1]} : vector<32x8xf32> to vector<32x1xf32>
    %c3 = arith.constant 3 : index
    %c0_15 = arith.constant 0 : index
    %c0_16 = arith.constant 0 : index
    %38 = vector.load %arg4[%c3, %c0_15, %c0_16] : memref<8x32x768xbf16, #tpu.memory_space<vmem>>, vector<1x32x768xbf16>
    %39 = vector.shape_cast %38 : vector<1x32x768xbf16> to vector<32x768xbf16>
    %40 = arith.extf %39 : vector<32x768xbf16> to vector<32x768xf32>
    %41 = vector.broadcast %37 : vector<32x1xf32> to vector<32x768xf32>
    %42 = arith.mulf %41, %40 : vector<32x768xf32>
    %43 = arith.addf %36, %42 : vector<32x768xf32>
    %44 = vector.extract_strided_slice %13 {offsets = [0, 4], sizes = [32, 1], strides = [1, 1]} : vector<32x8xf32> to vector<32x1xf32>
    %c4 = arith.constant 4 : index
    %c0_17 = arith.constant 0 : index
    %c0_18 = arith.constant 0 : index
    %45 = vector.load %arg4[%c4, %c0_17, %c0_18] : memref<8x32x768xbf16, #tpu.memory_space<vmem>>, vector<1x32x768xbf16>
    %46 = vector.shape_cast %45 : vector<1x32x768xbf16> to vector<32x768xbf16>
    %47 = arith.extf %46 : vector<32x768xbf16> to vector<32x768xf32>
    %48 = vector.broadcast %44 : vector<32x1xf32> to vector<32x768xf32>
    %49 = arith.mulf %48, %47 : vector<32x768xf32>
    %50 = arith.addf %43, %49 : vector<32x768xf32>
    %51 = vector.extract_strided_slice %13 {offsets = [0, 5], sizes = [32, 1], strides = [1, 1]} : vector<32x8xf32> to vector<32x1xf32>
    %c5 = arith.constant 5 : index
    %c0_19 = arith.constant 0 : index
    %c0_20 = arith.constant 0 : index
    %52 = vector.load %arg4[%c5, %c0_19, %c0_20] : memref<8x32x768xbf16, #tpu.memory_space<vmem>>, vector<1x32x768xbf16>
    %53 = vector.shape_cast %52 : vector<1x32x768xbf16> to vector<32x768xbf16>
    %54 = arith.extf %53 : vector<32x768xbf16> to vector<32x768xf32>
    %55 = vector.broadcast %51 : vector<32x1xf32> to vector<32x768xf32>
    %56 = arith.mulf %55, %54 : vector<32x768xf32>
    %57 = arith.addf %50, %56 : vector<32x768xf32>
    %58 = vector.extract_strided_slice %13 {offsets = [0, 6], sizes = [32, 1], strides = [1, 1]} : vector<32x8xf32> to vector<32x1xf32>
    %c6 = arith.constant 6 : index
    %c0_21 = arith.constant 0 : index
    %c0_22 = arith.constant 0 : index
    %59 = vector.load %arg4[%c6, %c0_21, %c0_22] : memref<8x32x768xbf16, #tpu.memory_space<vmem>>, vector<1x32x768xbf16>
    %60 = vector.shape_cast %59 : vector<1x32x768xbf16> to vector<32x768xbf16>
    %61 = arith.extf %60 : vector<32x768xbf16> to vector<32x768xf32>
    %62 = vector.broadcast %58 : vector<32x1xf32> to vector<32x768xf32>
    %63 = arith.mulf %62, %61 : vector<32x768xf32>
    %64 = arith.addf %57, %63 : vector<32x768xf32>
    %65 = vector.extract_strided_slice %13 {offsets = [0, 7], sizes = [32, 1], strides = [1, 1]} : vector<32x8xf32> to vector<32x1xf32>
    %c7 = arith.constant 7 : index
    %c0_23 = arith.constant 0 : index
    %c0_24 = arith.constant 0 : index
    %66 = vector.load %arg4[%c7, %c0_23, %c0_24] : memref<8x32x768xbf16, #tpu.memory_space<vmem>>, vector<1x32x768xbf16>
    %67 = vector.shape_cast %66 : vector<1x32x768xbf16> to vector<32x768xbf16>
    %68 = arith.extf %67 : vector<32x768xbf16> to vector<32x768xf32>
    %69 = vector.broadcast %65 : vector<32x1xf32> to vector<32x768xf32>
    %70 = arith.mulf %69, %68 : vector<32x768xf32>
    %71 = arith.addf %64, %70 : vector<32x768xf32>
    %72 = vector.extract_strided_slice %71 {offsets = [0, 0], sizes = [16, 768], strides = [1, 1]} : vector<32x768xf32> to vector<16x768xf32>
    %73 = arith.truncf %72 : vector<16x768xf32> to vector<16x768xbf16>
    %74 = vector.extract_strided_slice %71 {offsets = [16, 0], sizes = [16, 768], strides = [1, 1]} : vector<32x768xf32> to vector<16x768xf32>
    %75 = arith.truncf %74 : vector<16x768xf32> to vector<16x768xbf16>
    %c0_25 = arith.constant 0 : index
    %c0_26 = arith.constant 0 : index
    %76 = vector.load %arg6[%c0_25, %c0_26] : memref<16x768xf32, #tpu.memory_space<vmem>>, vector<16x768xf32>
    %77 = arith.truncf %76 : vector<16x768xf32> to vector<16x768xbf16>
    %cst_27 = arith.constant dense<0.000000e+00> : vector<16x16xf32>
    %78 = tpu.matmul %77, %73, %cst_27 {dimension_numbers = #tpu.dot_dimension_numbers<[1], [1], [0], [0], [0, 0, 1, 0], [], []>} : vector<16x768xbf16>, vector<16x768xbf16>, vector<16x16xf32> -> vector<16x16xf32>
    %cst_28 = arith.constant 0.000000e+00 : f32
    %79 = vector.broadcast %cst_28 : f32 to vector<16x16xf32>
    %80 = arith.maximumf %78, %79 : vector<16x16xf32>
    %81 = arith.truncf %80 : vector<16x16xf32> to vector<16x16xbf16>
    %cst_29 = arith.constant dense<0.000000e+00> : vector<16x768xf32>
    %82 = tpu.matmul %81, %75, %cst_29 {dimension_numbers = #tpu.dot_dimension_numbers<[1], [0], [0], [1], [0, 0, 1, 1], [], []>} : vector<16x16xbf16>, vector<16x768xbf16>, vector<16x768xf32> -> vector<16x768xf32>
    %83 = arith.addf %76, %82 : vector<16x768xf32>
    %c0_30 = arith.constant 0 : index
    %c0_31 = arith.constant 0 : index
    %84 = vector.load %arg7[%c0_30, %c0_31] : memref<16x768xf32, #tpu.memory_space<vmem>>, vector<16x768xf32>
    tpu.vector_store %arg7[%c0_30, %c0_31], %83 {strides = array<i32>} : memref<16x768xf32, #tpu.memory_space<vmem>>, vector<16x768xf32>,
    return
  }
  func.func @transform_0(%arg0: i32) -> (i32, i32) {
    %c0_i32 = arith.constant 0 : i32
    %c0_i32_0 = arith.constant 0 : i32
    %c0_i32_1 = arith.constant 0 : i32
    return %c0_i32, %c0_i32_0 : i32, i32
  }
  func.func @transform_1(%arg0: i32) -> (i32, i32) {
    %c0_i32 = arith.constant 0 : i32
    %c0_i32_0 = arith.constant 0 : i32
    %c0_i32_1 = arith.constant 0 : i32
    return %c0_i32, %c0_i32_0 : i32, i32
  }
  func.func @transform_2(%arg0: i32) -> (i32, i32) {
    %c0_i32 = arith.constant 0 : i32
    %c0_i32_0 = arith.constant 0 : i32
    %c0_i32_1 = arith.constant 0 : i32
    return %c0_i32, %c0_i32_0 : i32, i32
  }
  func.func @transform_3(%arg0: i32) -> (i32, i32, i32) {
    %c0_i32 = arith.constant 0 : i32
    %c0_i32_0 = arith.constant 0 : i32
    %c0_i32_1 = arith.constant 0 : i32
    %c0_i32_2 = arith.constant 0 : i32
    return %c0_i32, %c0_i32_0, %c0_i32_1 : i32, i32, i32
  }
  func.func @transform_4(%arg0: i32) -> (i32, i32) {
    %c0_i32 = arith.constant 0 : i32
    %c0_i32_0 = arith.constant 0 : i32
    %c0_i32_1 = arith.constant 0 : i32
    return %c0_i32, %c0_i32_0 : i32, i32
  }
  func.func @transform_5(%arg0: i32) -> (i32, i32) {
    %c0_i32 = arith.constant 0 : i32
    %c0_i32_0 = arith.constant 0 : i32
    return %arg0, %c0_i32 : i32, i32
  }
  func.func @transform_6(%arg0: i32) -> (i32, i32) {
    %c0_i32 = arith.constant 0 : i32
    %c0_i32_0 = arith.constant 0 : i32
    return %arg0, %c0_i32 : i32, i32
  }
}

</mosaic_0001>

<bundles_post_ra>
// kernel: adapter_wrapper_forward.1
= control target key start
LH: loop header
LB: loop body
LE: loop exit
PB: predicated region body
PF: predicated region fallthrough
CT: control target
= control target key end

     0   :  { %11 = vsyncpa [#allocation3], 0  ;;  %s2786_s0 = inlined_call_operand.vmem [shape: f32[1,256], index: 0, kind: input, shape index: {}]   ;;  %s2787_s1 = inlined_call_operand.vmem [shape: f32[256,16], index: 1, kind: input, shape index: {}]   ;;  %s2788_s2 = inlined_call_operand.vmem [shape: f32[1,16], index: 2, kind: input, shape index: {}]   ;;  %s2789_s3 = inlined_call_operand.hbm [shape: bf16[8,32,768], index: 3, kind: input, shape index: {}]   ;;  %s2790_s4 = inlined_call_operand.vmem [shape: bf16[32,768], index: 4, kind: input, shape index: {}]   ;;  %s2791_s5 = inlined_call_operand.vmem [shape: f32[16,768], index: 5, kind: input, shape index: {}]   ;;  %s2792_s6 = inlined_call_operand.hbm [shape: f32[16,768], index: 6, kind: output, shape index: {}]  }
   0x1   :  { %12 = vsyncpa [#allocation4], 0  ;;  %s1390_s21 = smov [#allocation2]  }
   0x2   :  { %s24_s22 = sshll.u32 %s1390_s21, 4  ;;  %s25_s22 = int_to_ptr.vmem [resolvable:$true] %s24_s22 }
   0x3   :  { %s1354_s23 = scalar_lea.vmem %s25_s22, 12288  ;;  %p1359_p1 = scmp.lt.s32.totalorder %s25_s22, %s25_s22 }
   0x4   :  { %p1355_p0 = scmp.ne.s32.totalorder %s25_s22, %s1354_s23  ;;  %p1360_p2 = scmp.lt.s32.totalorder %s1354_s23, %s1354_s23 }
   0x6   :  { %p1361_p3 = por %p1360_p2, %p1359_p1 }
   0x8   :  { %p1362_p4 = pnand %p1361_p3, %p1355_p0 }
   0xa   :  { %1365 = shalt.err (!%p1362_p4)
}
   0xb   :  { %s1391_s24 = smov 384   ;;  %s1392_s25 = smov 24  }
   0xc   :  { %30 = dma.hbm_to_vmem [thread:$0]  %s2789_s3, 12288, %s25_s22, [#allocation3], %s1391_s24, %s1391_s24, %s1392_s25  }
   0xd   :  { %1386 = dma.done.wait [#allocation3], 12288  }
   0xe   :  { %1387 = vsyncadd [#allocation3], 4294955008  ;;  %v74_v0 = vlaneseq  ;;  %v71_v1 = vld [vmem:[%s2787_s1 + $0xf8] sm:$0xff]  ;;  %v70_v3 = vld [vmem:[%s2787_s1 + $0xf0] sm:$0xff]  ;;  %v2799_v39 = vmov 2   ;;  %v2793_v40 = vmov 0  }
   0xf   :  { %v55_v2 = vld [vmem:[%s2787_s1 + $0x78] sm:$0xff]  ;;  %1274 = vmatprep.subr.mxu0 %v71_v1  ;;  %v54_v4 = vld [vmem:[%s2787_s1 + $0x70] sm:$0xff]  ;;  %v69_v5 = vld [vmem:[%s2787_s1 + $0xe8] sm:$0xff]  ;;  %1326 = vset.pattern.permute.xlu1 %v2799_v39  ;;  %v2797_v48 = vmov 3   ;;  %v1396_v49 = vmov 1   ;;  %v2800_v50 = vmov 4  }
  0x10   :  { %1275 = vmatpush3.msra.mxu0 %v55_v2  ;;  %v53_v6 = vld [vmem:[%s2787_s1 + $0x68] sm:$0xff]  ;;  %v1461_v7 = vshrl.u32 %v74_v0, 7  ;;  %v68_v8 = vld [vmem:[%s2787_s1 + $0xe0] sm:$0xff]  ;;  %v67_v10 = vld [vmem:[%s2787_s1 + $0xd8] sm:$0xff]  ;;  %1324 = vset.pattern.permute.xlu0 %v2793_v40  ;;  %v2796_v51 = vmov 5   ;;  %v2795_v52 = vmov 6  }
  0x11   :  { %1276 = vmatprep.subr.mxu0 %v70_v3  ;;  %v52_v9 = vld [vmem:[%s2787_s1 + $0x60] sm:$0xff]  ;;  %v51_v11 = vld [vmem:[%s2787_s1 + $0x58] sm:$0xff]  ;;  %v66_v13 = vld [vmem:[%s2787_s1 + $0xd0] sm:$0xff]  ;;  %v2798_v53 = vmov 7   ;;  %vm1097_vm0 = vcmask 130048   ;;  %s1402_s21 = smov [#allocation5]  }
  0x12   :  { %1277 = vmatpush3.msra.mxu0 %v54_v4  ;;  %v80_v12 = vsub.s32 1, %v1461_v7  ;;  %v50_v14 = vld [vmem:[%s2787_s1 + $0x50] sm:$0xff]  ;;  %v65_v15 = vld [vmem:[%s2787_s1 + $0xc8] sm:$0xff]  ;;  %v39_v16 = vld [vmem:[%s2786_s0] sm:$0x3]  ;;  %v76_v33 = vsub.s32 0, %v1461_v7 }
  0x13   :  { %1278 = vmatprep.subr.mxu0 %v69_v5  ;;  %v49_v17 = vld [vmem:[%s2787_s1 + $0x48] sm:$0xff]  ;;  %v64_v19 = vld [vmem:[%s2787_s1 + $0xc0] sm:$0xff]  ;;  %v63_v21 = vld [vmem:[%s2787_s1 + $0xb8] sm:$0xff]  ;;  %s1259_s22 = sshll.u32 %s1402_s21, 4  ;;  %s1260_s22 = int_to_ptr.vmem [resolvable:$true] %s1259_s22 }
  0x14   :  { %1279 = vmatpush3.msra.mxu0 %v53_v6  ;;  %v81_v18 = vrot.slane %v39_v16, %v80_v12  ;;  %v48_v20 = vld [vmem:[%s2787_s1 + $0x40] sm:$0xff]  ;;  %v47_v22 = vld [vmem:[%s2787_s1 + $0x38] sm:$0xff]  ;;  %v62_v23 = vld [vmem:[%s2787_s1 + $0xb0] sm:$0xff]  ;;  %v77_v38 = vrot.slane %v39_v16, %v76_v33  ;;  %p1371_p6 = scmp.lt.s32.totalorder %s1260_s22, %s1260_s22 }
  0x15   :  { %1280 = vmatprep.subr.mxu0 %v68_v8  ;;  %v46_v24 = vld [vmem:[%s2787_s1 + $0x30] sm:$0xff]  ;;  %v61_v25 = vld [vmem:[%s2787_s1 + $0xa8] sm:$0xff]  ;;  %v60_v27 = vld [vmem:[%s2787_s1 + $0xa0] sm:$0xff] }
  0x16   :  { %1281 = vmatpush3.msra.mxu0 %v52_v9  ;;  %148 = vmatprep.mubr.f32.mxu0 %v81_v18  ;;  %v45_v26 = vld [vmem:[%s2787_s1 + $0x28] sm:$0xff]  ;;  %v44_v28 = vld [vmem:[%s2787_s1 + $0x20] sm:$0xff]  ;;  %v59_v29 = vld [vmem:[%s2787_s1 + $0x98] sm:$0xff] }
  0x17   :  { %1282 = vmatprep.subr.mxu0 %v67_v10  ;;  %v43_v30 = vld [vmem:[%s2787_s1 + $0x18] sm:$0xff]  ;;  %v58_v31 = vld [vmem:[%s2787_s1 + $0x90] sm:$0xff]  ;;  %v57_v34 = vld [vmem:[%s2787_s1 + $0x88] sm:$0xff] }
  0x18   :  { %1283 = vmatpush3.msra.mxu0 %v51_v11  ;;  %v42_v32 = vld [vmem:[%s2787_s1 + $0x10] sm:$0xff]  ;;  %v41_v35 = vld [vmem:[%s2787_s1 + $0x8] sm:$0xff]  ;;  %v56_v36 = vld [vmem:[%s2787_s1 + $0x80] sm:$0xff] }
  0x19   :  { %1284 = vmatprep.subr.mxu0 %v66_v13  ;;  %v40_v37 = vld [vmem:[%s2787_s1] sm:$0xff]  ;;  %s1400_s1 = smov 120   ;;  %v954_v54 = vld [vmem:[%s2791_s5 + $0x8] sm:$0xff]  ;;  %v960_v55 = vld [vmem:[%s2791_s5 + $0x38] sm:$0xff] }
  0x1a   :  { %1285 = vmatpush3.msra.mxu0 %v50_v14  ;;  %v72_v42 = vld [vmem:[%s2788_s2] sm:$0x1]  ;;  %v966_v56 = vpack.c.bf16 %v960_v55, %v954_v54  ;;  %v1566_v58 = vld [vmem:[#allocation2 + $0x18] sm:$0xff]  ;;  %v1585_v2 = vld [vmem:[#allocation2 + $0x8] sm:$0xff] }
  0x1b   :  { %1286 = vmatprep.subr.mxu0 %v65_v15  ;;  %v1564_v57 = vld [vmem:[#allocation2] sm:$0xff]  ;;  %v1570_v60 = vld [vmem:[#allocation2 + $0xd8] sm:$0xff]  ;;  %v217_v0 = vunpack.c.h.bf16 %v1566_v58  ;;  %v1597_v10 = vld [vmem:[#allocation2 + $0xc8] sm:$0xff] }
  0x1c   :  { %1287 = vmatpush3.msra.mxu0 %v49_v17  ;;  %1003 = vmatprep.mubr.bf16.mxu1 %v966_v56  ;;  %v1568_v59 = vld [vmem:[#allocation2 + $0xc0] sm:$0xff]  ;;  %v1580_v62 = vld [vmem:[%s2790_s4 + $0x18] sm:$0xff]  ;;  %v211_v63 = vunpack.c.h.bf16 %v1564_v57  ;;  %v1611_v18 = vld [vmem:[%s2790_s4 + $0x8] sm:$0xff]  ;;  %v2892_v9 = vunpack.c.l.bf16 %v1564_v57 }
  0x1d   :  { %1288 = vmatprep.subr.mxu0 %v64_v19  ;;  %v1575_v61 = vld [vmem:[%s2790_s4] sm:$0xff]  ;;  %v397_v1 = vunpack.c.h.bf16 %v1568_v59  ;;  %v1591_v5 = vld [vmem:[#allocation2 + $0x78] sm:$0xff]  ;;  %v1727_v55 = vld [vmem:[%s2790_s4 + $0x28] sm:$0xff] }
  0x1e   :  { %1289 = vmatpush3.msra.mxu0 %v48_v20  ;;  %v1587_v3 = vld [vmem:[#allocation2 + $0x20] sm:$0xff]  ;;  %v1603_v14 = vld [vmem:[#allocation2 + $0x138] sm:$0xff]  ;;  %2878 = vst [vmem:[#allocation10_spill] sm:$0xff] %v1727_v55  ;;  %v1735_v19 = vld [vmem:[#allocation2 + $0xe8] sm:$0xff] }
  0x1f   :  { %1290 = vmatprep.subr.mxu0 %v63_v21  ;;  %v1589_v4 = vld [vmem:[#allocation2 + $0x60] sm:$0xff]  ;;  %v1711_v21 = vld [vmem:[#allocation2 + $0x2a8] sm:$0xff]  ;;  %2880 = vst [vmem:[#allocation12_spill] sm:$0xff] %v1735_v19  ;;  %v1759_v15 = vld [vmem:[#allocation2 + $0x130] sm:$0xff]  ;;  %v2902_v19 = vunpack.c.h.bf16 %v1597_v10  ;;  %v2915_v55 = vunpack.c.l.bf16 %v1603_v14 }
  0x20   :  { %1291 = vmatpush3.msra.mxu0 %v47_v22  ;;  %v1601_v13 = vld [vmem:[#allocation2 + $0x120] sm:$0xff]  ;;  %v1733_v22 = vld [vmem:[#allocation2 + $0xd0] sm:$0xff]  ;;  %v1757_v16 = vld [vmem:[#allocation2 + $0x88] sm:$0xff]  ;;  %2885 = vst [vmem:[#allocation17_spill] sm:$0xff] %v1759_v15 }
  0x21   :  { %1292 = vmatprep.subr.mxu0 %v62_v23  ;;  %v1653_v54 = vld [vmem:[#allocation2 + $0x140] sm:$0xff]  ;;  %v1703_v23 = vld [vmem:[#allocation2 + $0x10] sm:$0xff]  ;;  %2879 = vst [vmem:[#allocation11_spill] sm:$0xff] %v1733_v22  ;;  %2884 = vst [vmem:[#allocation16_spill] sm:$0xff] %v1757_v16 }
  0x22   :  { %1293 = vmatpush3.msra.mxu0 %v46_v24  ;;  %v1621_v24 = vld [vmem:[%s2790_s4 + $0x20] sm:$0xff]  ;;  %v1765_v11 = vld [vmem:[#allocation2 + $0x148] sm:$0xff]  ;;  %v1776_v20 = vld [vmem:[#allocation2 + $0x1f0] sm:$0xff] }
  0x23   :  { %1294 = vmatprep.subr.mxu0 %v61_v25  ;;  %v1697_v39 = vld [vmem:[#allocation2 + $0x260] sm:$0xff]  ;;  %2886 = vst [vmem:[#allocation18_spill] sm:$0xff] %v1765_v11  ;;  %v1774_v25 = vld [vmem:[#allocation2 + $0x1a8] sm:$0xff]  ;;  %2889 = vst [vmem:[#allocation21_spill] sm:$0xff] %v1776_v20  ;;  %v2894_v20 = vunpack.c.l.bf16 %v1568_v59 }
  0x24   :  { %1295 = vmatpush3.msra.mxu0 %v45_v26  ;;  %v1624_v26 = vld [vmem:[#allocation2 + $0x68] sm:$0xff]  ;;  %v1713_v56 = vld [vmem:[#allocation2 + $0x2c0] sm:$0xff]  ;;  %2888 = vst [vmem:[#allocation20_spill] sm:$0xff] %v1774_v25  ;;  %v2895_v25 = vunpack.c.l.bf16 %v1570_v60 }
  0x25   :  { %1296 = vmatprep.subr.mxu0 %v60_v27  ;;  %v1751_v27 = vld [vmem:[#allocation2 + $0x70] sm:$0xff] }
  0x26   :  { %1297 = vmatpush3.msra.mxu0 %v44_v28  ;;  %v1748_v28 = vld [vmem:[%s2791_s5 + $0x30] sm:$0xff]  ;;  %2883 = vst [vmem:[#allocation15_spill] sm:$0xff] %v1751_v27 }
  0x27   :  { %1298 = vmatprep.subr.mxu0 %v59_v29  ;;  %v1695_v29 = vld [vmem:[#allocation2 + $0x248] sm:$0xff]  ;;  %2882 = vst [vmem:[#allocation14_spill] sm:$0xff] %v1748_v28  ;;  %v2914_v28 = vunpack.c.l.bf16 %v1601_v13 }
  0x28   :  { %1299 = vmatpush3.msra.mxu0 %v43_v30  ;;  %v1722_v30 = vld [vmem:[%s2790_s4 + $0x10] sm:$0xff] }
  0x29   :  { %1300 = vmatprep.subr.mxu0 %v58_v31  ;;  %v1630_v31 = vld [vmem:[#allocation2 + $0x80] sm:$0xff]  ;;  %2877 = vst [vmem:[#allocation9_spill] sm:$0xff] %v1722_v30 }
  0x2a   :  { %1301 = vmatpush3.msra.mxu0 %v42_v32  ;;  %v1632_v32 = vld [vmem:[#allocation2 + $0xe0] sm:$0xff] }
  0x2b   :  { %1302 = vmatprep.subr.mxu0 %v57_v34  ;;  %v1635_v34 = vld [vmem:[#allocation2 + $0x180] sm:$0xff] }
  0x2c   :  { %1303 = vmatpush3.msra.mxu0 %v41_v35  ;;  %v1637_v35 = vld [vmem:[#allocation2 + $0x198] sm:$0xff] }
  0x2d   :  { %1304 = vmatprep.subr.mxu0 %v56_v36  ;;  %v1639_v36 = vld [vmem:[#allocation2 + $0x1e0] sm:$0xff] }
  0x2e   :  { %1305 = vmatpush3.msra.mxu0 %v40_v37  ;;  %v1743_v37 = vld [vmem:[%s2791_s5] sm:$0xff] }
  0x2f   :  { %149 = vmatmul.mubr.f32.vlgmr.msra.gmra.mxu0 %v77_v38  ;;  %v1681_v38 = vld [vmem:[#allocation2 + $0x200] sm:$0xff]  ;;  %2881 = vst [vmem:[#allocation13_spill] sm:$0xff] %v1743_v37  ;;  %v2909_v37 = vunpack.c.h.bf16 %v1591_v5 }
  0x30   :  { %1176 = vmatprep.mubr.bf16.mxu0 %v2793_v40 }
  0xef   :  { %v1306_v41 = vpop.f32.mrf.mxu0 }
  0xf1   :  { %v1307_v43 = vpop.f32.mrf.mxu0 }
  0xf2   :  { %v1308_v44 = vadd.f32 %v1307_v43, %v1306_v41  ;;  %v1645_v43 = vld [vmem:[#allocation2 + $0x1f8] sm:$0xff]  ;;  %v1679_v41 = vld [vmem:[#allocation2 + $0x1e8] sm:$0xff] }
  0xf4   :  { %v151_v45 = vadd.f32 %v1308_v44, %v72_v42  ;;  %v1662_v42 = vld [vmem:[#allocation2 + $0x240] sm:$0xff] }
  0xf6   :  { %v154_v46 = vmax.f32 %v151_v45, 0.0  ;;  %v2891_v45 = vunpack.c.h.bf16 %v1570_v60  ;;  %v2901_v60 = vunpack.c.l.bf16 %v1580_v62 }
  0xf8   :  { %v158_v47 = vrot.slane %v154_v46, %v76_v33  ;;  %v1767_v46 = vld [vmem:[#allocation2 + $0x190] sm:$0xff]  ;;  %v2893_v33 = vunpack.c.l.bf16 %v1566_v58 }
  0xf9   :  { %2887 = vst [vmem:[#allocation19_spill] sm:$0xff] %v1767_v46  ;;  %v2896_v46 = vunpack.c.h.bf16 %v1575_v61 }
  0xfa   :  { %421 = vperm.xlu1 %1326, %v158_v47   ;;  %235 = vperm.xlu0 %1324, %v158_v47  }
  0xfe   :  { %1327 = vset.pattern.permute.xlu1 %v2797_v48  ;;  %1325 = vset.pattern.permute.xlu0 %v1396_v49 }
  0xff   :  { %514 = vperm.xlu1 %1327, %v158_v47   ;;  %328 = vperm.xlu0 %1325, %v158_v47  }
 0x103   :  { %1328 = vset.pattern.permute.xlu1 %v2800_v50  ;;  %1329 = vset.pattern.permute.xlu0 %v2796_v51  ;;  %v1673_v51 = vld [vmem:[#allocation2 + $0x1a0] sm:$0xff]  ;;  %v1687_v50 = vld [vmem:[#allocation2 + $0x2b8] sm:$0xff] }
 0x104   :  { %607 = vperm.xlu1 %1328, %v158_v47   ;;  %700 = vperm.xlu0 %1329, %v158_v47  }
 0x108   :  { %1330 = vset.pattern.permute.xlu1 %v2795_v52  ;;  %160 = vrot.lane.b32.xlu0 %v158_v47, %s1400_s1  ;;  %v1685_v52 = vld [vmem:[#allocation2 + $0x2a0] sm:$0xff] }
 0x109   :  { %793 = vperm.xlu1 %1330, %v158_v47   ;;  %1333 = vset.pattern.permute.xlu0 %v1396_v49  ;;  %v1651_v49 = vld [vmem:[#allocation2 + $0x128] sm:$0xff] }
 0x10d   :  { %1331 = vset.pattern.permute.xlu1 %v2798_v53  ;;  %v1667_v53 = vld [vmem:[#allocation2 + $0x188] sm:$0xff] }
 0x10e   :  { %886 = vperm.xlu1 %1331, %v158_v47   ;;  %v1664_v47 = vld [vmem:[#allocation2 + $0x258] sm:$0xff] }
 0x112   :  { %1332 = vset.pattern.permute.xlu1 %v2793_v40  ;;  %v1705_v40 = vld [vmem:[#allocation2 + $0x28] sm:$0xff] }
 0x113   :  { %2876 = vst [vmem:[#allocation8_spill] sm:$0xff] %v1705_v40 }
 0x175   :  { %v1786_v7 = vpop.permute.xlu1 %421  ;;  %v1788_v6 = vpop.permute.xlu0 %235 }
 0x176   :  { %2890 = vst [vmem:[#allocation22_spill] sm:$0xff] %v1788_v6  ;;  %v243_v44 = vmul.f32 %v1788_v6, %v211_v63  ;;  %v249_v48 = vmul.f32 %v1788_v6, %v217_v0  ;;  %v429_v17 = vmul.f32 %v1786_v7, %v397_v1  ;;  %v435_v12 = vmul.f32 %v1786_v7, %v2891_v45 }
 0x177   :  { %v242_v8 = vmul.f32 %v1788_v6, %v2892_v9  ;;  %v248_v63 = vmul.f32 %v1788_v6, %v2893_v33  ;;  %v428_v0 = vmul.f32 %v1786_v7, %v2894_v20  ;;  %v434_v1 = vmul.f32 %v1786_v7, %v2895_v25 }
 0x178   :  { %v267_v11 = vadd.f32 %v243_v44, %v2896_v46  ;;  %v2897_v45 = vunpack.c.h.bf16 %v1580_v62  ;;  %v2898_v9 = vunpack.c.h.bf16 %v1585_v2  ;;  %v2899_v33 = vunpack.c.h.bf16 %v1587_v3 }
 0x179   :  { %v2900_v20 = vunpack.c.l.bf16 %v1575_v61  ;;  %v272_v25 = vadd.f32 %v248_v63, %v2901_v60  ;;  %v431_v44 = vmul.f32 %v1786_v7, %v2902_v19  ;;  %v2905_v61 = vunpack.c.h.bf16 %v1621_v24 }
 0x17a   :  { %v273_v57 = vadd.f32 %v249_v48, %v2897_v45  ;;  %v245_v58 = vmul.f32 %v1788_v6, %v2898_v9  ;;  %v251_v59 = vmul.f32 %v1788_v6, %v2899_v33  ;;  %v2903_v48 = vunpack.c.h.bf16 %v1632_v32  ;;  %v1838_v45 = vpop.permute.xlu1 %514  ;;  %v1840_v9 = vpop.permute.xlu0 %328 }
 0x17b   :  { %v266_v15 = vadd.f32 %v242_v8, %v2900_v20  ;;  %v2904_v33 = vunpack.c.h.bf16 %v1611_v18  ;;  %v2906_v62 = vunpack.c.l.bf16 %v1585_v2  ;;  %v2907_v19 = vunpack.c.l.bf16 %v1587_v3 }
 0x17c   :  { %v437_v46 = vmul.f32 %v1786_v7, %v2903_v48  ;;  %v275_v8 = vadd.f32 %v251_v59, %v2905_v61  ;;  %v2908_v60 = vunpack.c.h.bf16 %v1589_v4  ;;  %v2910_v59 = vunpack.c.h.bf16 %v1601_v13 }
 0x17d   :  { %v269_v22 = vadd.f32 %v245_v58, %v2904_v33  ;;  %v1849_v63 = vmul.f32 %v1788_v6, %v2906_v62  ;;  %v1854_v20 = vmul.f32 %v1788_v6, %v2907_v19  ;;  %v342_v58 = vmul.f32 %v1840_v9, %v2909_v37 }
 0x17e   :  { %v336_v48 = vmul.f32 %v1840_v9, %v2908_v60  ;;  %v522_v2 = vmul.f32 %v1838_v45, %v2910_v59  ;;  %v2911_v33 = vunpack.c.h.bf16 %v1603_v14  ;;  %v2912_v3 = vunpack.c.l.bf16 %v1589_v4 }
 0x17f   :  { %v2913_v19 = vunpack.c.l.bf16 %v1591_v5  ;;  %v521_v37 = vmul.f32 %v1838_v45, %v2914_v28  ;;  %v527_v59 = vmul.f32 %v1838_v45, %v2915_v55  ;;  %v366_v16 = vadd.f32 %v342_v58, %v273_v57  ;;  %v1894_v57 = vpop.permute.xlu0 %700 }
 0x180   :  { %v528_v61 = vmul.f32 %v1838_v45, %v2911_v33  ;;  %v335_v62 = vmul.f32 %v1840_v9, %v2912_v3  ;;  %v360_v30 = vadd.f32 %v336_v48, %v267_v11  ;;  %v2916_v33 = vunpack.c.h.bf16 %v1624_v26  ;;  %v1892_v11 = vpop.permute.xlu1 %607 }
 0x181   :  { %v341_v60 = vmul.f32 %v1840_v9, %v2913_v19  ;;  %v2917_v3 = vunpack.c.h.bf16 %v1630_v31  ;;  %v2918_v13 = vunpack.c.h.bf16 %v1651_v49  ;;  %v2919_v14 = vunpack.c.h.bf16 %v1653_v54 }
 0x182   :  { %v338_v4 = vmul.f32 %v1840_v9, %v2916_v33  ;;  %v359_v27 = vadd.f32 %v335_v62, %v266_v15  ;;  %v453_v48 = vadd.f32 %v429_v17, %v360_v30  ;;  %v459_v58 = vadd.f32 %v435_v12, %v366_v16  ;;  %v1908_v30 = vld [vmem:[#allocation2 + $0x208] sm:$0xff] }
 0x183   :  { %v344_v5 = vmul.f32 %v1840_v9, %v2917_v3  ;;  %v365_v19 = vadd.f32 %v341_v60, %v272_v25  ;;  %v524_v28 = vmul.f32 %v1838_v45, %v2918_v13  ;;  %v530_v55 = vmul.f32 %v1838_v45, %v2919_v14 }
 0x184   :  { %v362_v33 = vadd.f32 %v338_v4, %v269_v22  ;;  %v2920_v3 = vunpack.c.h.bf16 %v1635_v34  ;;  %v2921_v25 = vunpack.c.h.bf16 %v1637_v35  ;;  %v2922_v60 = vunpack.c.h.bf16 %v1639_v36 }
 0x185   :  { %v368_v40 = vadd.f32 %v344_v5, %v275_v8  ;;  %v2923_v14 = vunpack.c.h.bf16 %v1645_v43  ;;  %v546_v17 = vadd.f32 %v522_v2, %v453_v48  ;;  %v552_v12 = vadd.f32 %v528_v61, %v459_v58 }
 0x186   :  { %v615_v15 = vmul.f32 %v1892_v11, %v2920_v3  ;;  %v621_v62 = vmul.f32 %v1892_v11, %v2921_v25  ;;  %v708_v13 = vmul.f32 %v1894_v57, %v2922_v60  ;;  %v452_v16 = vadd.f32 %v428_v0, %v359_v27  ;;  %v1922_v27 = vpop.permute.xlu0 %160 }
 0x187   :  { %v714_v6 = vmul.f32 %v1894_v57, %v2923_v14  ;;  %v458_v22 = vadd.f32 %v434_v1, %v365_v19  ;;  %v2924_v8 = vunpack.c.l.bf16 %v1635_v34  ;;  %v2925_v5 = vunpack.c.l.bf16 %v1637_v35  ;;  %v1924_v19 = vpop.permute.xlu1 %793  ;;  %332 = vperm.xlu0 %1333, %v1922_v27   ;;  %239 = vperm.xlu1 %1332, %v1922_v27  }
 0x188   :  { %v2926_v25 = vunpack.c.l.bf16 %v1639_v36  ;;  %v2927_v14 = vunpack.c.l.bf16 %v1645_v43  ;;  %v639_v0 = vadd.f32 %v615_v15, %v546_v17  ;;  %v645_v1 = vadd.f32 %v621_v62, %v552_v12 }
 0x189   :  { %v614_v4 = vmul.f32 %v1892_v11, %v2924_v8  ;;  %v620_v3 = vmul.f32 %v1892_v11, %v2925_v5  ;;  %v545_v61 = vadd.f32 %v521_v37, %v452_v16  ;;  %v551_v34 = vadd.f32 %v527_v59, %v458_v22 }
 0x18a   :  { %v707_v60 = vmul.f32 %v1894_v57, %v2926_v25  ;;  %v713_v2 = vmul.f32 %v1894_v57, %v2927_v14  ;;  %v455_v35 = vadd.f32 %v431_v44, %v362_v33  ;;  %v461_v36 = vadd.f32 %v437_v46, %v368_v40 }
 0x18b   :  { %v2928_v48 = vunpack.c.h.bf16 %v1667_v53  ;;  %v685_v58 = vunpack.c.l.bf16 %v1908_v30  ;;  %v732_v8 = vadd.f32 %v708_v13, %v639_v0  ;;  %v738_v5 = vadd.f32 %v714_v6, %v645_v1  ;;  %v1944_v13 = vld [vmem:[#allocation2 + $0x250] sm:$0xff] }
 0x18c   :  { %v2929_v15 = vunpack.c.h.bf16 %v1662_v42  ;;  %v2930_v59 = vunpack.c.h.bf16 %v1664_v47  ;;  %v638_v17 = vadd.f32 %v614_v4, %v545_v61  ;;  %v644_v12 = vadd.f32 %v620_v3, %v551_v34  ;;  %v1952_v61 = vpop.permute.xlu1 %886 }
 0x18d   :  { %v617_v43 = vmul.f32 %v1892_v11, %v2928_v48  ;;  %v2931_v40 = vunpack.c.l.bf16 %v1662_v42  ;;  %v2932_v46 = vunpack.c.l.bf16 %v1664_v47  ;;  %v548_v22 = vadd.f32 %v524_v28, %v455_v35 }
 0x18e   :  { %v801_v37 = vmul.f32 %v1924_v19, %v2929_v15  ;;  %v807_v62 = vmul.f32 %v1924_v19, %v2930_v59  ;;  %v554_v25 = vadd.f32 %v530_v55, %v461_v36  ;;  %v2933_v14 = vmov 4  }
 0x18f   :  { %v800_v44 = vmul.f32 %v1924_v19, %v2931_v40  ;;  %v806_v33 = vmul.f32 %v1924_v19, %v2932_v46  ;;  %1336 = vset.pattern.permute.xlu0 %v2933_v14  ;;  %v2934_v0 = vmov 2   ;;  %v731_v4 = vadd.f32 %v707_v60, %v638_v17  ;;  %v1975_v46 = vld [vmem:[#allocation2 + $0x268] sm:$0xff] }
 0x190   :  { %v825_v6 = vadd.f32 %v801_v37, %v732_v8  ;;  %v831_v16 = vadd.f32 %v807_v62, %v738_v5  ;;  %1334 = vset.pattern.permute.xlu1 %v2934_v0  ;;  %v737_v3 = vadd.f32 %v713_v2, %v644_v12  ;;  %v2935_v42 = vunpack.c.h.bf16 %v1673_v51  ;;  %611 = vperm.xlu0 %1336, %v1922_v27  }
 0x191   :  { %v686_v47 = vunpack.c.h.bf16 %v1908_v30  ;;  %425 = vperm.xlu1 %1334, %v1922_v27   ;;  %v641_v28 = vadd.f32 %v617_v43, %v548_v22  ;;  %v2936_v55 = vunpack.c.h.bf16 %v1679_v41  ;;  %v2937_v60 = vunpack.c.h.bf16 %v1681_v38  ;;  %v2193_v30 = vld [vmem:[%s2791_s5 + $0x50] sm:$0xff] }
 0x192   :  { %v623_v1 = vmul.f32 %v1892_v11, %v2935_v42  ;;  %v772_v35 = vunpack.c.l.bf16 %v1944_v13  ;;  %v2938_v36 = vunpack.c.h.bf16 %v1685_v52  ;;  %v2939_v8 = vunpack.c.h.bf16 %v1687_v50 }
 0x193   :  { %v710_v34 = vmul.f32 %v1894_v57, %v2936_v55  ;;  %v716_v2 = vmul.f32 %v1894_v57, %v2937_v60  ;;  %v824_v15 = vadd.f32 %v800_v44, %v731_v4  ;;  %v830_v43 = vadd.f32 %v806_v33, %v737_v3  ;;  %v1992_v60 = vld [vmem:[#allocation2 + $0x2b0] sm:$0xff] }
 0x194   :  { %v894_v48 = vmul.f32 %v1952_v61, %v2938_v36  ;;  %v900_v5 = vmul.f32 %v1952_v61, %v2939_v8  ;;  %v2940_v37 = vunpack.c.l.bf16 %v1685_v52  ;;  %v2941_v62 = vunpack.c.l.bf16 %v1687_v50  ;;  %v962_v36 = vld [vmem:[%s2791_s5 + $0x48] sm:$0xff] }
 0x195   :  { %v647_v12 = vadd.f32 %v623_v1, %v554_v25  ;;  %v734_v40 = vadd.f32 %v710_v34, %v641_v28  ;;  %v2942_v0 = vunpack.c.h.bf16 %v1695_v29  ;;  %v2943_v44 = vunpack.c.h.bf16 %v1697_v39 }
 0x196   :  { %v893_v59 = vmul.f32 %v1952_v61, %v2940_v37  ;;  %v899_v17 = vmul.f32 %v1952_v61, %v2941_v62  ;;  %v918_v22 = vadd.f32 %v894_v48, %v825_v6  ;;  %v924_v14 = vadd.f32 %v900_v5, %v831_v16 }
 0x197   :  { %v803_v42 = vmul.f32 %v1924_v19, %v2942_v0  ;;  %v809_v52 = vmul.f32 %v1924_v19, %v2943_v44  ;;  %v2944_v33 = vmov 7   ;;  %v2945_v4 = vmov 3  }
 0x198   :  { %1339 = vset.pattern.permute.xlu0 %v2944_v33  ;;  %1335 = vset.pattern.permute.xlu1 %v2945_v4  ;;  %v917_v50 = vadd.f32 %v893_v59, %v824_v15  ;;  %v923_v3 = vadd.f32 %v899_v17, %v830_v43  ;;  %v740_v25 = vadd.f32 %v716_v2, %v647_v12  ;;  %v773_v1 = vunpack.c.h.bf16 %v1944_v13  ;;  %v956_v2 = vld [vmem:[%s2791_s5 + $0x18] sm:$0xff] }
 0x199   :  { %890 = vperm.xlu0 %1339, %v1922_v27   ;;  %518 = vperm.xlu1 %1335, %v1922_v27   ;;  %v942_v6 = vpack.c.bf16 %v924_v14, %v918_v22  ;;  %v827_v16 = vadd.f32 %v803_v42, %v734_v40  ;;  %v2946_v28 = vunpack.c.h.bf16 %v1711_v21  ;;  %v779_v34 = vunpack.c.h.bf16 %v1975_v46 }
 0x19a   :  { %v941_v48 = vpack.c.bf16 %v923_v3, %v917_v50  ;;  %v833_v8 = vadd.f32 %v809_v52, %v740_v25  ;;  %v2947_v5 = vunpack.c.h.bf16 %v1713_v56  ;;  %v2948_v43 = vunpack.c.l.bf16 %v1611_v18 }
 0x19b   :  { %v896_v55 = vmul.f32 %v1952_v61, %v2946_v28  ;;  %985 = vmatprep.subr.bf16.mxu1 %v942_v6  ;;  %v2949_v62 = vunpack.c.l.bf16 %v1621_v24  ;;  %v2950_v12 = vunpack.c.l.bf16 %v1624_v26  ;;  %v2951_v22 = vunpack.c.l.bf16 %v1630_v31 }
 0x19c   :  { %v902_v15 = vmul.f32 %v1952_v61, %v2947_v5  ;;  %v268_v37 = vadd.f32 %v1849_v63, %v2948_v43  ;;  %986 = vmatpush1.bf16.xpose.msra.mxu1 %v941_v48  ;;  %v2952_v18 = vunpack.c.l.bf16 %v1597_v10  ;;  %v866_v42 = vunpack.c.h.bf16 %v1992_v60 }
 0x19d   :  { %v920_v59 = vadd.f32 %v896_v55, %v827_v16  ;;  %v274_v17 = vadd.f32 %v1854_v20, %v2949_v62  ;;  %v337_v40 = vmul.f32 %v1840_v9, %v2950_v12  ;;  %v343_v14 = vmul.f32 %v1840_v9, %v2951_v22  ;;  %v2967_v12 = vld [vmem:[#allocation15_spill] sm:$0xff]  ;;  %v2969_v22 = vld [vmem:[#allocation16_spill] sm:$0xff] }
 0x19e   :  { %v926_v0 = vadd.f32 %v902_v15, %v833_v8  ;;  %v430_v63 = vmul.f32 %v1786_v7, %v2952_v18  ;;  %v968_v44 = vpack.c.bf16 %v962_v36, %v956_v2  ;;  %v2953_v24 = vmov 5   ;;  %v2964_v15 = vld [vmem:[#allocation22_spill] sm:$0xff] }
 0x19f   :  { %1337 = vset.pattern.permute.xlu1 %v2953_v24  ;;  %v361_v20 = vadd.f32 %v337_v40, %v268_v37  ;;  %v367_v52 = vadd.f32 %v343_v14, %v274_v17  ;;  %v2954_v26 = vunpack.c.l.bf16 %v1632_v32  ;;  %v2955_v31 = vunpack.c.l.bf16 %v1651_v49 }
 0x1a0   :  { %v944_v50 = vpack.c.bf16 %v926_v0, %v920_v59  ;;  %704 = vperm.xlu1 %1337, %v1922_v27   ;;  %v2956_v10 = vunpack.c.l.bf16 %v1653_v54  ;;  %v2957_v25 = vunpack.c.l.bf16 %v1667_v53  ;;  %v2958_v16 = vunpack.c.l.bf16 %v1673_v51 }
 0x1a1   :  { %v436_v33 = vmul.f32 %v1786_v7, %v2954_v26  ;;  %v523_v4 = vmul.f32 %v1838_v45, %v2955_v31  ;;  %v454_v28 = vadd.f32 %v430_v63, %v361_v20  ;;  %v2959_v49 = vunpack.c.l.bf16 %v1679_v41  ;;  %v2965_v41 = vld [vmem:[#allocation8_spill] sm:$0xff]  ;;  %v2976_v31 = vld [vmem:[#allocation10_spill] sm:$0xff] }
 0x1a2   :  { %v529_v3 = vmul.f32 %v1838_v45, %v2956_v10  ;;  %v616_v6 = vmul.f32 %v1892_v11, %v2957_v25  ;;  %v622_v32 = vmul.f32 %v1892_v11, %v2958_v16  ;;  %v2960_v36 = vunpack.c.l.bf16 %v1681_v38  ;;  %1026 = vmatprep.subr.bf16.mxu1 %v944_v50  ;;  %v2054_v38 = vld [vmem:[#allocation2 + $0x2c8] sm:$0xff]  ;;  %v2978_v10 = vld [vmem:[#allocation14_spill] sm:$0xff]  ;;  %3013 = vst [vmem:[#allocation10_spill] sm:$0xff] %v2193_v30 }
 0x1a3   :  { %v460_v55 = vadd.f32 %v436_v33, %v367_v52  ;;  %v709_v2 = vmul.f32 %v1894_v57, %v2959_v49  ;;  %v2961_v48 = vunpack.c.l.bf16 %v1695_v29  ;;  %v2962_v8 = vunpack.c.l.bf16 %v1697_v39  ;;  %v2974_v52 = vld [vmem:[#allocation9_spill] sm:$0xff] }
 0x1a4   :  { %v715_v54 = vmul.f32 %v1894_v57, %v2960_v36  ;;  %v2963_v5 = vunpack.c.h.bf16 %v1703_v23  ;;  %v2966_v37 = vunpack.c.h.bf16 %v2965_v41  ;;  %v547_v62 = vadd.f32 %v523_v4, %v454_v28  ;;  %v2981_v28 = vld [vmem:[#allocation11_spill] sm:$0xff] }
 0x1a5   :  { %v802_v53 = vmul.f32 %v1924_v19, %v2961_v48  ;;  %v808_v51 = vmul.f32 %v1924_v19, %v2962_v8  ;;  %v553_v17 = vadd.f32 %v529_v3, %v460_v55  ;;  %v2968_v29 = vunpack.c.h.bf16 %v2967_v12  ;;  %v2979_v3 = vld [vmem:[#allocation13_spill] sm:$0xff]  ;;  %v2983_v8 = vld [vmem:[#allocation12_spill] sm:$0xff] }
 0x1a6   :  { %v247_v43 = vmul.f32 %v2964_v15, %v2963_v5  ;;  %v253_v59 = vmul.f32 %v2964_v15, %v2966_v37  ;;  %v2970_v39 = vunpack.c.h.bf16 %v2969_v22  ;;  %v2971_v0 = vmov 6   ;;  %v2985_v37 = vld [vmem:[#allocation17_spill] sm:$0xff] }
 0x1a7   :  { %v340_v40 = vmul.f32 %v1840_v9, %v2968_v29  ;;  %1338 = vset.pattern.permute.xlu1 %v2971_v0  ;;  %v2972_v18 = vunpack.c.l.bf16 %v1711_v21  ;;  %v2973_v24 = vunpack.c.l.bf16 %v1713_v56  ;;  %v2975_v26 = vunpack.c.h.bf16 %v2974_v52 }
 0x1a8   :  { %v346_v14 = vmul.f32 %v1840_v9, %v2970_v39  ;;  %v2977_v4 = vunpack.c.h.bf16 %v2976_v31  ;;  %v2980_v25 = vpack.c.bf16 %v2978_v10, %v2979_v3  ;;  %797 = vperm.xlu1 %1338, %v1922_v27   ;;  %v640_v16 = vadd.f32 %v616_v6, %v547_v62  ;;  %v2989_v39 = vld [vmem:[#allocation19_spill] sm:$0xff] }
 0x1a9   :  { %v895_v63 = vmul.f32 %v1952_v61, %v2972_v18  ;;  %v901_v20 = vmul.f32 %v1952_v61, %v2973_v24  ;;  %v271_v33 = vadd.f32 %v247_v43, %v2975_v26  ;;  %v646_v21 = vadd.f32 %v622_v32, %v553_v17  ;;  %v2987_v32 = vld [vmem:[#allocation18_spill] sm:$0xff]  ;;  %v2991_v24 = vld [vmem:[#allocation20_spill] sm:$0xff] }
 0x1aa   :  { %v277_v50 = vadd.f32 %v253_v59, %v2977_v4  ;;  %1004 = vmatmul.mubr.bf16.vlgmr.msra.gmra.mxu1 %v2980_v25  ;;  %v2982_v55 = vunpack.c.h.bf16 %v2981_v28  ;;  %v872_v49 = vunpack.c.h.bf16 %v2054_v38  ;;  %v2984_v5 = vunpack.c.h.bf16 %v2983_v8  ;;  %v2993_v4 = vld [vmem:[#allocation21_spill] sm:$0xff] }
 0x1ab   :  { %v364_v36 = vadd.f32 %v340_v40, %v271_v33  ;;  %v2986_v59 = vunpack.c.h.bf16 %v2985_v37  ;;  %1044 = vmatprep.mubr.bf16.mxu1 %v968_v44  ;;  %v733_v27 = vadd.f32 %v709_v2, %v640_v16  ;;  %v739_v6 = vadd.f32 %v715_v54, %v646_v21 }
 0x1ac   :  { %v433_v56 = vmul.f32 %v1786_v7, %v2982_v55  ;;  %v370_v48 = vadd.f32 %v346_v14, %v277_v50  ;;  %v439_v43 = vmul.f32 %v1786_v7, %v2984_v5  ;;  %v2988_v62 = vunpack.c.h.bf16 %v2987_v32 }
 0x1ad   :  { %v526_v29 = vmul.f32 %v1838_v45, %v2986_v59  ;;  %v2990_v0 = vunpack.c.h.bf16 %v2989_v39  ;;  %v2992_v26 = vunpack.c.h.bf16 %v2991_v24  ;;  %v2994_v50 = vunpack.c.h.bf16 %v2993_v4 }
 0x1ae   :  { %v532_v17 = vmul.f32 %v1838_v45, %v2988_v62  ;;  %v457_v14 = vadd.f32 %v433_v56, %v364_v36  ;;  %v463_v18 = vadd.f32 %v439_v43, %v370_v48  ;;  %v826_v2 = vadd.f32 %v802_v53, %v733_v27 }
 0x1af   :  { %v619_v40 = vmul.f32 %v1892_v11, %v2990_v0  ;;  %v625_v33 = vmul.f32 %v1892_v11, %v2992_v26  ;;  %v712_v44 = vmul.f32 %v1894_v57, %v2994_v50  ;;  %v832_v54 = vadd.f32 %v808_v51, %v739_v6  ;;  %v2154_v50 = vld [vmem:[%s2791_s5 + $0x28] sm:$0xff] }
 0x1b0   :  { %v718_v10 = vmul.f32 %v1894_v57, %v686_v47  ;;  %v805_v3 = vmul.f32 %v1924_v19, %v773_v1  ;;  %v550_v25 = vadd.f32 %v526_v29, %v457_v14  ;;  %v556_v16 = vadd.f32 %v532_v17, %v463_v18  ;;  %3007 = vst [vmem:[#allocation15_spill] sm:$0xff] %v2154_v50 }
 0x1b1   :  { %v811_v21 = vmul.f32 %v1924_v19, %v779_v34  ;;  %v2995_v55 = vunpack.c.l.bf16 %v1703_v23  ;;  %v919_v53 = vadd.f32 %v895_v63, %v826_v2  ;;  %v925_v51 = vadd.f32 %v901_v20, %v832_v54 }
 0x1b2   :  { %v2996_v36 = vunpack.c.l.bf16 %v2965_v41  ;;  %v2997_v48 = vunpack.c.l.bf16 %v2967_v12  ;;  %v643_v5 = vadd.f32 %v619_v40, %v550_v25  ;;  %v649_v43 = vadd.f32 %v625_v33, %v556_v16 }
 0x1b3   :  { %v246_v56 = vmul.f32 %v2964_v15, %v2995_v55  ;;  %v2998_v59 = vunpack.c.l.bf16 %v2974_v52  ;;  %v2999_v34 = vunpack.c.l.bf16 %v2969_v22  ;;  %v943_v27 = vpack.c.bf16 %v925_v51, %v919_v53  ;;  %v2135_v22 = vld [vmem:[%s2791_s5 + $0x10] sm:$0xff] }
 0x1b4   :  { %v252_v47 = vmul.f32 %v2964_v15, %v2996_v36  ;;  %v339_v1 = vmul.f32 %v1840_v9, %v2997_v48  ;;  %v898_v41 = vmul.f32 %v1952_v61, %v866_v42  ;;  %v904_v15 = vmul.f32 %v1952_v61, %v872_v49  ;;  %3002 = vst [vmem:[#allocation22_spill] sm:$0xff] %v2135_v22  ;;  %v2140_v42 = vld [vmem:[%s2791_s5 + $0x40] sm:$0xff] }
 0x1b5   :  { %v270_v29 = vadd.f32 %v246_v56, %v2998_v59  ;;  %v345_v23 = vmul.f32 %v1840_v9, %v2999_v34  ;;  %v3000_v12 = vunpack.c.l.bf16 %v2976_v31  ;;  %v736_v20 = vadd.f32 %v712_v44, %v643_v5  ;;  %1027 = vmatpush1.bf16.xpose.msra.mxu1 %v943_v27  ;;  %3003 = vst [vmem:[#allocation8_spill] sm:$0xff] %v2140_v42  ;;  %v2206_v59 = vld [vmem:[%s2790_s4 + $0x48] sm:$0xff] }
 0x1b6   :  { %v742_v6 = vadd.f32 %v718_v10, %v649_v43  ;;  %v3001_v52 = vunpack.c.l.bf16 %v2981_v28  ;;  %v778_v9 = vunpack.c.l.bf16 %v1975_v46  ;;  %v3004_v49 = vunpack.c.l.bf16 %v2983_v8  ;;  %v2210_v34 = vld [vmem:[#allocation2 + $0x48] sm:$0xff] }
 0x1b7   :  { %v276_v63 = vadd.f32 %v252_v47, %v3000_v12  ;;  %v363_v62 = vadd.f32 %v339_v1, %v270_v29  ;;  %v3005_v0 = vunpack.c.l.bf16 %v2985_v37  ;;  %v829_v46 = vadd.f32 %v805_v3, %v736_v20  ;;  %v2208_v29 = vld [vmem:[#allocation2 + $0x30] sm:$0xff]  ;;  %v2214_v27 = vld [vmem:[#allocation2 + $0xa8] sm:$0xff]  ;;  %v2329_v12 = vld [vmem:[#allocation2 + $0x278] sm:$0xff] }
 0x1b8   :  { %v432_v17 = vmul.f32 %v1786_v7, %v3001_v52  ;;  %v438_v28 = vmul.f32 %v1786_v7, %v3004_v49  ;;  %v835_v14 = vadd.f32 %v811_v21, %v742_v6  ;;  %v3006_v26 = vunpack.c.l.bf16 %v2989_v39  ;;  %v2159_v7 = vld [vmem:[%s2791_s5 + $0x58] sm:$0xff]  ;;  %v2221_v20 = vld [vmem:[#allocation2 + $0x108] sm:$0xff]  ;;  %v2399_v52 = vld [vmem:[#allocation2 + $0x220] sm:$0xff] }
 0x1b9   :  { %v369_v31 = vadd.f32 %v345_v23, %v276_v63  ;;  %v525_v40 = vmul.f32 %v1838_v45, %v3005_v0  ;;  %3008 = vst [vmem:[#allocation16_spill] sm:$0xff] %v2159_v7  ;;  %v865_v8 = vunpack.c.l.bf16 %v1992_v60  ;;  %v3009_v44 = vunpack.c.l.bf16 %v2987_v32  ;;  %v2212_v23 = vld [vmem:[#allocation2 + $0x90] sm:$0xff]  ;;  %v2391_v0 = vld [vmem:[#allocation2 + $0x1c0] sm:$0xff]  ;;  %3030 = vst [vmem:[#allocation29_spill] sm:$0xff] %v2399_v52 }
 0x1ba   :  { %v456_v18 = vadd.f32 %v432_v17, %v363_v62  ;;  %v618_v33 = vmul.f32 %v1892_v11, %v3006_v26  ;;  %v3010_v39 = vunpack.c.l.bf16 %v2991_v24  ;;  %v922_v10 = vadd.f32 %v898_v41, %v829_v46  ;;  %v2219_v63 = vld [vmem:[#allocation2 + $0xf0] sm:$0xff]  ;;  %v2348_v26 = vld [vmem:[%s2790_s4 + $0x40] sm:$0xff]  ;;  %3028 = vst [vmem:[#allocation27_spill] sm:$0xff] %v2391_v0  ;;  %v2393_v17 = vld [vmem:[#allocation2 + $0x1d8] sm:$0xff] }
 0x1bb   :  { %v462_v37 = vadd.f32 %v438_v28, %v369_v31  ;;  %v531_v2 = vmul.f32 %v1838_v45, %v3009_v44  ;;  %v928_v3 = vadd.f32 %v904_v15, %v835_v14  ;;  %v967_v25 = vpack.c.bf16 %v2140_v42, %v2135_v22  ;;  %v2229_v31 = vld [vmem:[#allocation2 + $0x168] sm:$0xff]  ;;  %v2235_v46 = vld [vmem:[#allocation2 + $0x1b0] sm:$0xff]  ;;  %v2337_v28 = vld [vmem:[#allocation2 + $0x2d8] sm:$0xff]  ;;  %3018 = vst [vmem:[#allocation12_spill] sm:$0xff] %v2348_v26 }
 0x1bc   :  { %v624_v54 = vmul.f32 %v1892_v11, %v3010_v39  ;;  %v549_v16 = vadd.f32 %v525_v40, %v456_v18  ;;  %v871_v21 = vunpack.c.l.bf16 %v2054_v38  ;;  %v970_v60 = vpack.c.bf16 %v2159_v7, %v2154_v50  ;;  %v2237_v14 = vld [vmem:[#allocation2 + $0x1c8] sm:$0xff]  ;;  %v2331_v41 = vld [vmem:[#allocation2 + $0x290] sm:$0xff]  ;;  %3016 = vst [vmem:[#allocation13_spill] sm:$0xff] %v2337_v28  ;;  %v2353_v40 = vld [vmem:[%s2790_s4 + $0x58] sm:$0xff] }
 0x1bd   :  { %v555_v55 = vadd.f32 %v531_v2, %v462_v37  ;;  %v946_v56 = vpack.c.bf16 %v928_v3, %v922_v10  ;;  %v3011_v45 = vunpack.c.l.bf16 %v2993_v4  ;;  %v804_v11 = vmul.f32 %v1924_v19, %v772_v35  ;;  %1045 = vmatmul.mubr.bf16.vlgmr.msra.gmra.mxu1 %v967_v25  ;;  %v2243_v37 = vld [vmem:[#allocation2 + $0x210] sm:$0xff]  ;;  %v2245_v44 = vld [vmem:[#allocation2 + $0x228] sm:$0xff]  ;;  %3019 = vst [vmem:[#allocation17_spill] sm:$0xff] %v2353_v40  ;;  %v2367_v15 = vld [vmem:[#allocation2 + $0xa0] sm:$0xff] }
 0x1be   :  { %v642_v32 = vadd.f32 %v618_v33, %v549_v16  ;;  %v717_v51 = vmul.f32 %v1894_v57, %v685_v58  ;;  %v810_v38 = vmul.f32 %v1924_v19, %v778_v9  ;;  %v897_v47 = vmul.f32 %v1952_v61, %v865_v8  ;;  %1085 = vmatprep.mubr.bf16.mxu1 %v970_v60  ;;  %v2227_v9 = vld [vmem:[#allocation2 + $0x150] sm:$0xff]  ;;  %v2253_v25 = vld [vmem:[#allocation2 + $0x288] sm:$0xff]  ;;  %v2313_v60 = vld [vmem:[#allocation2 + $0x1b8] sm:$0xff] }
 0x1bf   :  { %v711_v24 = vmul.f32 %v1894_v57, %v3011_v45  ;;  %v648_v53 = vadd.f32 %v624_v54, %v555_v55  ;;  %1067 = vmatprep.subr.bf16.mxu1 %v946_v56  ;;  %v903_v4 = vmul.f32 %v1952_v61, %v871_v21  ;;  %v2188_v57 = vld [vmem:[%s2791_s5 + $0x20] sm:$0xff]  ;;  %v3014_v58 = vmov 0   ;;  %v2201_v61 = vld [vmem:[%s2790_s4 + $0x30] sm:$0xff]  ;;  %v2321_v45 = vld [vmem:[#allocation2 + $0x218] sm:$0xff]  ;;  %3022 = vst [vmem:[#allocation20_spill] sm:$0xff] %v2367_v15 }
 0x1c0   :  { %3012 = vst [vmem:[#allocation9_spill] sm:$0xff] %v2188_v57  ;;  %v969_v19 = vpack.c.bf16 %v2193_v30, %v2188_v57  ;;  %v2251_v3 = vld [vmem:[#allocation2 + $0x270] sm:$0xff]  ;;  %v2359_v8 = vld [vmem:[#allocation2 + $0x40] sm:$0xff]  ;;  %v2369_v39 = vld [vmem:[#allocation2 + $0xb8] sm:$0xff]  ;;  %v3037_v62 = vunpack.c.h.bf16 %v2210_v34  ;;  %v3039_v18 = vunpack.c.h.bf16 %v2214_v27 }
 0x1c1   :  { %v735_v36 = vadd.f32 %v711_v24, %v642_v32  ;;  %v741_v48 = vadd.f32 %v717_v51, %v648_v53  ;;  %v2259_v56 = vld [vmem:[#allocation2 + $0x2d0] sm:$0xff]  ;;  %v2261_v32 = vld [vmem:[#allocation2 + $0x2e8] sm:$0xff]  ;;  %v2270_v51 = vld [vmem:[%s2790_s4 + $0x38] sm:$0xff]  ;;  %3020 = vst [vmem:[#allocation18_spill] sm:$0xff] %v2359_v8 }
 0x1c2   :  { %v2289_v53 = vld [vmem:[#allocation2 + $0x98] sm:$0xff]  ;;  %v2291_v24 = vld [vmem:[#allocation2 + $0xb0] sm:$0xff]  ;;  %3023 = vst [vmem:[#allocation21_spill] sm:$0xff] %v2369_v39  ;;  %v2375_v16 = vld [vmem:[#allocation2 + $0x100] sm:$0xff] }
 0x1c3   :  { %v828_v1 = vadd.f32 %v804_v11, %v735_v36  ;;  %v834_v13 = vadd.f32 %v810_v38, %v741_v48  ;;  %v2275_v38 = vld [vmem:[%s2790_s4 + $0x50] sm:$0xff]  ;;  %v2297_v11 = vld [vmem:[#allocation2 + $0xf8] sm:$0xff]  ;;  %3024 = vst [vmem:[#allocation23_spill] sm:$0xff] %v2375_v16  ;;  %v2383_v10 = vld [vmem:[#allocation2 + $0x160] sm:$0xff]  ;;  %v3043_v52 = vunpack.c.h.bf16 %v2291_v24  ;;  %v3050_v16 = vunpack.c.l.bf16 %v2212_v23 }
 0x1c4   :  { %v2315_v21 = vld [vmem:[#allocation2 + $0x1d0] sm:$0xff]  ;;  %v2377_v48 = vld [vmem:[#allocation2 + $0x118] sm:$0xff]  ;;  %3026 = vst [vmem:[#allocation25_spill] sm:$0xff] %v2383_v10  ;;  %3029 = vst [vmem:[#allocation28_spill] sm:$0xff] %v2393_v17  ;;  %v3044_v17 = vunpack.c.h.bf16 %v2201_v61 }
 0x1c5   :  { %v921_v5 = vadd.f32 %v897_v47, %v828_v1  ;;  %v927_v35 = vadd.f32 %v903_v4, %v834_v13  ;;  %v2281_v1 = vld [vmem:[#allocation2 + $0x38] sm:$0xff]  ;;  %v2283_v13 = vld [vmem:[#allocation2 + $0x50] sm:$0xff]  ;;  %3015 = vst [vmem:[#allocation14_spill] sm:$0xff] %v2315_v21  ;;  %3025 = vst [vmem:[#allocation24_spill] sm:$0xff] %v2377_v48  ;;  %v3036_v4 = vunpack.c.h.bf16 %v2208_v29  ;;  %v3049_v48 = vunpack.c.h.bf16 %v2275_v38 }
 0x1c6   :  { %v2307_v47 = vld [vmem:[#allocation2 + $0x170] sm:$0xff]  ;;  %v2385_v54 = vld [vmem:[#allocation2 + $0x178] sm:$0xff]  ;;  %v2407_v30 = vld [vmem:[#allocation2 + $0x280] sm:$0xff]  ;;  %v3040_v33 = vunpack.c.h.bf16 %v2281_v1 }
 0x1c7   :  { %v945_v43 = vpack.c.bf16 %v927_v35, %v921_v5  ;;  %v2299_v5 = vld [vmem:[#allocation2 + $0x110] sm:$0xff]  ;;  %v2361_v35 = vld [vmem:[#allocation2 + $0x58] sm:$0xff]  ;;  %3027 = vst [vmem:[#allocation26_spill] sm:$0xff] %v2385_v54  ;;  %3032 = vst [vmem:[#allocation31_spill] sm:$0xff] %v2407_v30  ;;  %v3038_v30 = vunpack.c.h.bf16 %v2212_v23  ;;  %v3055_v23 = vunpack.c.h.bf16 %v2219_v63 }
 0x1c8   :  { %v2323_v55 = vld [vmem:[#allocation2 + $0x230] sm:$0xff]  ;;  %3021 = vst [vmem:[#allocation19_spill] sm:$0xff] %v2361_v35  ;;  %v2401_v2 = vld [vmem:[#allocation2 + $0x238] sm:$0xff]  ;;  %v2415_v57 = vld [vmem:[#allocation2 + $0x2e0] sm:$0xff] }
 0x1c9   :  { %1068 = vmatpush1.bf16.xpose.msra.mxu1 %v945_v43  ;;  %v2305_v43 = vld [vmem:[#allocation2 + $0x158] sm:$0xff]  ;;  %v2339_v36 = vld [vmem:[#allocation2 + $0x2f0] sm:$0xff]  ;;  %3031 = vst [vmem:[#allocation30_spill] sm:$0xff] %v2401_v2  ;;  %3034 = vst [vmem:[#allocation33_spill] sm:$0xff] %v2415_v57  ;;  %v3041_v57 = vunpack.c.h.bf16 %v2283_v13 }
 0x1ca   :  { %3017 = vst [vmem:[#allocation11_spill] sm:$0xff] %v2339_v36  ;;  %v2409_v6 = vld [vmem:[#allocation2 + $0x298] sm:$0xff] }
 0x1cb   :  { %3033 = vst [vmem:[#allocation32_spill] sm:$0xff] %v2409_v6  ;;  %v3042_v6 = vunpack.c.h.bf16 %v2289_v53 }
 0x1d0   :  { %1086 = vmatmul.mubr.bf16.vlgmr.msra.gmra.mxu1 %v969_v19  ;;  %v2417_v19 = vld [vmem:[#allocation2 + $0x2f8] sm:$0xff] }
 0x1d1   :  { %1133 = vmatprep.mubr.bf16.mxu1 %v3014_v58  ;;  %3035 = vst [vmem:[#allocation34_spill] sm:$0xff] %v2417_v19 }
 0x202   :  { %v2427_v22 = vpop.permute.xlu0 %332  ;;  %v2429_v58 = vpop.permute.xlu1 %239 }
 0x203   :  { %v255_v49 = vmul.f32 %v2429_v58, %v3036_v4  ;;  %v261_v50 = vmul.f32 %v2429_v58, %v3037_v62  ;;  %v348_v2 = vmul.f32 %v2427_v22, %v3038_v30  ;;  %v354_v7 = vmul.f32 %v2427_v22, %v3039_v18 }
 0x204   :  { %v257_v42 = vmul.f32 %v2429_v58, %v3040_v33  ;;  %v263_v4 = vmul.f32 %v2429_v58, %v3041_v57  ;;  %v350_v62 = vmul.f32 %v2427_v22, %v3042_v6  ;;  %v356_v30 = vmul.f32 %v2427_v22, %v3043_v52 }
 0x205   :  { %v279_v0 = vadd.f32 %v255_v49, %v3044_v17  ;;  %v3045_v18 = vunpack.c.h.bf16 %v2206_v59  ;;  %v3046_v33 = vunpack.c.l.bf16 %v2208_v29  ;;  %v3047_v57 = vunpack.c.l.bf16 %v2210_v34 }
 0x206   :  { %v3048_v6 = vunpack.c.h.bf16 %v2270_v51  ;;  %v287_v52 = vadd.f32 %v263_v4, %v3049_v48  ;;  %v347_v17 = vmul.f32 %v2427_v22, %v3050_v16 }
 0x207   :  { %v285_v54 = vadd.f32 %v261_v50, %v3045_v18  ;;  %v254_v10 = vmul.f32 %v2429_v58, %v3046_v33  ;;  %v260_v40 = vmul.f32 %v2429_v58, %v3047_v57  ;;  %v3051_v50 = vunpack.c.l.bf16 %v2214_v27 }
 0x208   :  { %v281_v26 = vadd.f32 %v257_v42, %v3048_v6  ;;  %v372_v34 = vadd.f32 %v348_v2, %v279_v0  ;;  %v3053_v57 = vunpack.c.l.bf16 %v2201_v61  ;;  %v3054_v6 = vunpack.c.l.bf16 %v2206_v59 }
 0x209   :  { %v353_v29 = vmul.f32 %v2427_v22, %v3051_v50  ;;  %v378_v33 = vadd.f32 %v354_v7, %v285_v54  ;;  %v3056_v27 = vunpack.c.h.bf16 %v2221_v20  ;;  %v3057_v50 = vunpack.c.h.bf16 %v2235_v46 }
 0x20a   :  { %v278_v42 = vadd.f32 %v254_v10, %v3053_v57  ;;  %v284_v48 = vadd.f32 %v260_v40, %v3054_v6  ;;  %v3058_v7 = vunpack.c.h.bf16 %v2237_v14  ;;  %v374_v0 = vadd.f32 %v350_v62, %v281_v26 }
 0x20b   :  { %v2479_v49 = vpop.permute.xlu0 %611  ;;  %v380_v2 = vadd.f32 %v356_v30, %v287_v52  ;;  %v3059_v59 = vunpack.c.h.bf16 %v2297_v11  ;;  %v3060_v54 = vunpack.c.h.bf16 %v2299_v5 }
 0x20c   :  { %3052 = vst [vmem:[#allocation35_spill] sm:$0xff] %v2479_v49  ;;  %v2481_v18 = vpop.permute.xlu1 %425  ;;  %v627_v39 = vmul.f32 %v2479_v49, %v3057_v50  ;;  %v633_v61 = vmul.f32 %v2479_v49, %v3058_v7  ;;  %v3062_v50 = vunpack.c.h.bf16 %v2315_v21  ;;  %v371_v30 = vadd.f32 %v347_v17, %v278_v42 }
 0x20d   :  { %v441_v16 = vmul.f32 %v2481_v18, %v3055_v23  ;;  %v447_v4 = vmul.f32 %v2481_v18, %v3056_v27  ;;  %v443_v40 = vmul.f32 %v2481_v18, %v3059_v59  ;;  %v449_v10 = vmul.f32 %v2481_v18, %v3060_v54 }
 0x20e   :  { %v3061_v23 = vunpack.c.h.bf16 %v2313_v60  ;;  %v635_v7 = vmul.f32 %v2479_v49, %v3062_v50  ;;  %v377_v52 = vadd.f32 %v353_v29, %v284_v48  ;;  %v3063_v54 = vunpack.c.l.bf16 %v2219_v63 }
 0x20f   :  { %v465_v57 = vadd.f32 %v441_v16, %v372_v34  ;;  %v471_v6 = vadd.f32 %v447_v4, %v378_v33  ;;  %v467_v26 = vadd.f32 %v443_v40, %v374_v0  ;;  %v473_v62 = vadd.f32 %v449_v10, %v380_v2 }
 0x210   :  { %v629_v27 = vmul.f32 %v2479_v49, %v3061_v23  ;;  %v440_v34 = vmul.f32 %v2481_v18, %v3063_v54  ;;  %v3064_v33 = vunpack.c.l.bf16 %v2221_v20  ;;  %v3065_v4 = vunpack.c.l.bf16 %v2235_v46 }
 0x211   :  { %v3066_v0 = vunpack.c.l.bf16 %v2237_v14  ;;  %v3067_v29 = vunpack.c.h.bf16 %v2227_v9  ;;  %v3068_v63 = vunpack.c.h.bf16 %v2229_v31  ;;  %v3069_v20 = vunpack.c.h.bf16 %v2259_v56 }
 0x212   :  { %v446_v16 = vmul.f32 %v2481_v18, %v3064_v33  ;;  %v626_v23 = vmul.f32 %v2479_v49, %v3065_v4  ;;  %v3070_v46 = vunpack.c.h.bf16 %v2261_v32  ;;  %v3071_v14 = vunpack.c.h.bf16 %v2305_v43 }
 0x213   :  { %v632_v17 = vmul.f32 %v2479_v49, %v3066_v0  ;;  %v3072_v50 = vunpack.c.h.bf16 %v2307_v47  ;;  %v3073_v33 = vunpack.c.h.bf16 %v2337_v28  ;;  %v3074_v0 = vunpack.c.h.bf16 %v2339_v36 }
 0x214   :  { %v2511_v15 = vpop.permute.xlu0 %890  ;;  %v2513_v59 = vpop.permute.xlu1 %518  ;;  %v464_v35 = vadd.f32 %v440_v34, %v371_v30 }
 0x215   :  { %v534_v42 = vmul.f32 %v2513_v59, %v3067_v29  ;;  %v540_v48 = vmul.f32 %v2513_v59, %v3068_v63  ;;  %v906_v2 = vmul.f32 %v2511_v15, %v3069_v20  ;;  %v912_v40 = vmul.f32 %v2511_v15, %v3070_v46 }
 0x216   :  { %v536_v10 = vmul.f32 %v2513_v59, %v3071_v14  ;;  %v542_v54 = vmul.f32 %v2513_v59, %v3072_v50  ;;  %v908_v4 = vmul.f32 %v2511_v15, %v3073_v33  ;;  %v914_v29 = vmul.f32 %v2511_v15, %v3074_v0 }
 0x217   :  { %v558_v63 = vadd.f32 %v534_v42, %v465_v57  ;;  %v564_v20 = vadd.f32 %v540_v48, %v471_v6  ;;  %v470_v46 = vadd.f32 %v446_v16, %v377_v52  ;;  %v3075_v14 = vunpack.c.l.bf16 %v2227_v9 }
 0x218   :  { %v560_v8 = vadd.f32 %v536_v10, %v467_v26  ;;  %v566_v19 = vadd.f32 %v542_v54, %v473_v62  ;;  %v3076_v50 = vunpack.c.l.bf16 %v2229_v31  ;;  %v3077_v0 = vunpack.c.l.bf16 %v2259_v56 }
 0x219   :  { %v533_v21 = vmul.f32 %v2513_v59, %v3075_v14  ;;  %v651_v33 = vadd.f32 %v627_v39, %v558_v63  ;;  %v657_v36 = vadd.f32 %v633_v61, %v564_v20  ;;  %v3078_v6 = vunpack.c.l.bf16 %v2261_v32 }
 0x21a   :  { %v539_v28 = vmul.f32 %v2513_v59, %v3076_v50  ;;  %v905_v57 = vmul.f32 %v2511_v15, %v3077_v0  ;;  %v3079_v9 = vunpack.c.h.bf16 %v2243_v37  ;;  %v3080_v31 = vunpack.c.h.bf16 %v2245_v44 }
 0x21b   :  { %v2557_v49 = vpop.permute.xlu1 %704  ;;  %v911_v26 = vmul.f32 %v2511_v15, %v3078_v6  ;;  %v653_v52 = vadd.f32 %v629_v27, %v560_v8  ;;  %v659_v34 = vadd.f32 %v635_v7, %v566_v19  ;;  %v3081_v39 = vunpack.c.h.bf16 %v2321_v45 }
 0x21c   :  { %v720_v62 = vmul.f32 %v2557_v49, %v3079_v9  ;;  %v726_v30 = vmul.f32 %v2557_v49, %v3080_v31  ;;  %v3082_v61 = vunpack.c.h.bf16 %v2323_v55  ;;  %v557_v16 = vadd.f32 %v533_v21, %v464_v35 }
 0x21d   :  { %v722_v56 = vmul.f32 %v2557_v49, %v3081_v39  ;;  %v563_v42 = vadd.f32 %v539_v28, %v470_v46  ;;  %v3083_v54 = vunpack.c.l.bf16 %v2243_v37  ;;  %v3084_v20 = vunpack.c.l.bf16 %v2245_v44 }
 0x21e   :  { %v728_v32 = vmul.f32 %v2557_v49, %v3082_v61  ;;  %v744_v48 = vadd.f32 %v720_v62, %v651_v33  ;;  %v750_v10 = vadd.f32 %v726_v30, %v657_v36  ;;  %v650_v7 = vadd.f32 %v626_v23, %v557_v16 }
 0x21f   :  { %v719_v63 = vmul.f32 %v2557_v49, %v3083_v54  ;;  %v725_v8 = vmul.f32 %v2557_v49, %v3084_v20  ;;  %v746_v19 = vadd.f32 %v722_v56, %v653_v52  ;;  %v656_v14 = vadd.f32 %v632_v17, %v563_v42 }
 0x220   :  { %v752_v27 = vadd.f32 %v728_v32, %v659_v34  ;;  %v3085_v0 = vunpack.c.l.bf16 %v2281_v1  ;;  %v3086_v21 = vunpack.c.l.bf16 %v2283_v13  ;;  %v3087_v36 = vunpack.c.l.bf16 %v2289_v53 }
 0x221   :  { %v3088_v35 = vunpack.c.l.bf16 %v2291_v24  ;;  %v3089_v23 = vunpack.c.h.bf16 %v2251_v3  ;;  %v3090_v1 = vunpack.c.h.bf16 %v2253_v25  ;;  %v3091_v13 = vunpack.c.h.bf16 %v2329_v12 }
 0x222   :  { %v256_v28 = vmul.f32 %v2429_v58, %v3085_v0  ;;  %v262_v37 = vmul.f32 %v2429_v58, %v3086_v21  ;;  %v349_v44 = vmul.f32 %v2427_v22, %v3087_v36  ;;  %v3092_v53 = vunpack.c.h.bf16 %v2331_v41 }
 0x223   :  { %v2583_v50 = vpop.permute.xlu1 %797  ;;  %v355_v46 = vmul.f32 %v2427_v22, %v3088_v35  ;;  %v743_v62 = vadd.f32 %v719_v63, %v650_v7  ;;  %v749_v24 = vadd.f32 %v725_v8, %v656_v14  ;;  %v3093_v31 = vunpack.c.l.bf16 %v2251_v3 }
 0x224   :  { %v813_v17 = vmul.f32 %v2583_v50, %v3089_v23  ;;  %v819_v33 = vmul.f32 %v2583_v50, %v3090_v1  ;;  %v815_v6 = vmul.f32 %v2583_v50, %v3091_v13  ;;  %v821_v9 = vmul.f32 %v2583_v50, %v3092_v53 }
 0x225   :  { %v812_v30 = vmul.f32 %v2583_v50, %v3093_v31  ;;  %v3094_v52 = vunpack.c.l.bf16 %v2253_v25  ;;  %v3095_v54 = vunpack.c.l.bf16 %v2270_v51  ;;  %v3096_v63 = vunpack.c.l.bf16 %v2275_v38  ;;  %v3110_v31 = vld [vmem:[#allocation13_spill] sm:$0xff] }
 0x226   :  { %v837_v39 = vadd.f32 %v813_v17, %v744_v48  ;;  %v843_v56 = vadd.f32 %v819_v33, %v750_v10  ;;  %v839_v61 = vadd.f32 %v815_v6, %v746_v19  ;;  %v845_v32 = vadd.f32 %v821_v9, %v752_v27  ;;  %v3105_v17 = vld [vmem:[#allocation34_spill] sm:$0xff] }
 0x227   :  { %v818_v34 = vmul.f32 %v2583_v50, %v3094_v52  ;;  %v836_v16 = vadd.f32 %v812_v30, %v743_v62  ;;  %v280_v20 = vadd.f32 %v256_v28, %v3095_v54  ;;  %v286_v8 = vadd.f32 %v262_v37, %v3096_v63  ;;  %v3112_v52 = vld [vmem:[#allocation11_spill] sm:$0xff] }
 0x228   :  { %v930_v7 = vadd.f32 %v906_v2, %v837_v39  ;;  %v936_v3 = vadd.f32 %v912_v40, %v843_v56  ;;  %v932_v14 = vadd.f32 %v908_v4, %v839_v61  ;;  %v938_v0 = vadd.f32 %v914_v29, %v845_v32  ;;  %v3114_v39 = vld [vmem:[#allocation18_spill] sm:$0xff]  ;;  %v3116_v61 = vld [vmem:[#allocation19_spill] sm:$0xff] }
 0x229   :  { %v842_v42 = vadd.f32 %v818_v34, %v749_v24  ;;  %v929_v21 = vadd.f32 %v905_v57, %v836_v16  ;;  %v373_v36 = vadd.f32 %v349_v44, %v280_v20  ;;  %v379_v35 = vadd.f32 %v355_v46, %v286_v8  ;;  %v3118_v16 = vld [vmem:[#allocation20_spill] sm:$0xff]  ;;  %v3120_v20 = vld [vmem:[#allocation21_spill] sm:$0xff] }
 0x22a   :  { %v948_v48 = vpack.c.bf16 %v936_v3, %v930_v7  ;;  %v950_v10 = vpack.c.bf16 %v938_v0, %v932_v14  ;;  %v3097_v19 = vunpack.c.l.bf16 %v2297_v11  ;;  %v3098_v51 = vunpack.c.l.bf16 %v2299_v5  ;;  %v3103_v5 = vld [vmem:[#allocation14_spill] sm:$0xff]  ;;  %v3122_v14 = vld [vmem:[#allocation23_spill] sm:$0xff] }
 0x22b   :  { %v935_v25 = vadd.f32 %v911_v26, %v842_v42  ;;  %v3099_v2 = vunpack.c.l.bf16 %v2305_v43  ;;  %v3100_v4 = vunpack.c.l.bf16 %v2307_v47  ;;  %v3101_v57 = vunpack.c.l.bf16 %v2313_v60  ;;  %v3102_v26 = vld [vmem:[#allocation35_spill] sm:$0xff] }
 0x22c   :  { %v442_v27 = vmul.f32 %v2481_v18, %v3097_v19  ;;  %v448_v28 = vmul.f32 %v2481_v18, %v3098_v51  ;;  %1115 = vmatprep.subr.bf16.mxu1 %v948_v48  ;;  %1158 = vmatprep.subr.bf16.mxu0 %v950_v10  ;;  %v3104_v46 = vunpack.c.l.bf16 %v3103_v5  ;;  %v884_v43 = vunpack.c.h.bf16 %v3105_v17  ;;  %v3126_v48 = vld [vmem:[#allocation12_spill] sm:$0xff] }
 0x22d   :  { %v947_v38 = vpack.c.bf16 %v935_v25, %v929_v21  ;;  %v535_v40 = vmul.f32 %v2513_v59, %v3099_v2  ;;  %v541_v29 = vmul.f32 %v2513_v59, %v3100_v4  ;;  %v628_v37 = vmul.f32 %v3102_v26, %v3101_v57  ;;  %v3124_v25 = vld [vmem:[#allocation24_spill] sm:$0xff]  ;;  %v3132_v4 = vld [vmem:[#allocation26_spill] sm:$0xff] }
 0x22e   :  { %v466_v11 = vadd.f32 %v442_v27, %v373_v36  ;;  %v472_v44 = vadd.f32 %v448_v28, %v379_v35  ;;  %v634_v23 = vmul.f32 %v3102_v26, %v3104_v46  ;;  %v3106_v1 = vunpack.c.l.bf16 %v2321_v45  ;;  %v3128_v27 = vld [vmem:[#allocation17_spill] sm:$0xff] }
 0x22f   :  { %1116 = vmatpush1.bf16.msra.mxu1 %v947_v38  ;;  %v3107_v33 = vunpack.c.l.bf16 %v2323_v55  ;;  %v3108_v13 = vunpack.c.l.bf16 %v2329_v12  ;;  %v3109_v53 = vunpack.c.l.bf16 %v2331_v41  ;;  %v3111_v30 = vunpack.c.l.bf16 %v3110_v31  ;;  %v3130_v38 = vld [vmem:[#allocation25_spill] sm:$0xff] }
 0x230   :  { %v721_v47 = vmul.f32 %v2557_v49, %v3106_v1  ;;  %v559_v62 = vadd.f32 %v535_v40, %v466_v11  ;;  %v565_v24 = vadd.f32 %v541_v29, %v472_v44  ;;  %v3113_v34 = vunpack.c.l.bf16 %v3112_v52  ;;  %v3134_v44 = vld [vmem:[#allocation27_spill] sm:$0xff] }
 0x231   :  { %v727_v60 = vmul.f32 %v2557_v49, %v3107_v33  ;;  %v814_v6 = vmul.f32 %v2583_v50, %v3108_v13  ;;  %v820_v9 = vmul.f32 %v2583_v50, %v3109_v53  ;;  %v907_v45 = vmul.f32 %v2511_v15, %v3111_v30  ;;  %v3140_v30 = vld [vmem:[#allocation30_spill] sm:$0xff] }
 0x232   :  { %v913_v55 = vmul.f32 %v2511_v15, %v3113_v34  ;;  %v3115_v56 = vunpack.c.h.bf16 %v3114_v39  ;;  %v3117_v32 = vunpack.c.h.bf16 %v3116_v61  ;;  %v3119_v42 = vunpack.c.h.bf16 %v3118_v16 }
 0x233   :  { %v3121_v63 = vunpack.c.h.bf16 %v3120_v20  ;;  %v652_v7 = vadd.f32 %v628_v37, %v559_v62  ;;  %v658_v3 = vadd.f32 %v634_v23, %v565_v24  ;;  %v3123_v0 = vunpack.c.h.bf16 %v3122_v14  ;;  %v3136_v23 = vld [vmem:[#allocation28_spill] sm:$0xff]  ;;  %v3138_v62 = vld [vmem:[#allocation29_spill] sm:$0xff] }
 0x234   :  { %v259_v12 = vmul.f32 %v2429_v58, %v3115_v56  ;;  %v265_v41 = vmul.f32 %v2429_v58, %v3117_v32  ;;  %v352_v54 = vmul.f32 %v2427_v22, %v3119_v42  ;;  %v3125_v36 = vunpack.c.h.bf16 %v3124_v25  ;;  %v3142_v56 = vld [vmem:[#allocation31_spill] sm:$0xff] }
 0x235   :  { %v358_v8 = vmul.f32 %v2427_v22, %v3121_v63  ;;  %v445_v21 = vmul.f32 %v2481_v18, %v3123_v0  ;;  %v3127_v10 = vunpack.c.h.bf16 %v3126_v48  ;;  %v3129_v51 = vunpack.c.h.bf16 %v3128_v27 }
 0x236   :  { %v451_v35 = vmul.f32 %v2481_v18, %v3125_v36  ;;  %v3131_v2 = vunpack.c.h.bf16 %v3130_v38  ;;  %v3133_v29 = vunpack.c.h.bf16 %v3132_v4  ;;  %v745_v37 = vadd.f32 %v721_v47, %v652_v7  ;;  %v3146_v7 = vld [vmem:[#allocation33_spill] sm:$0xff] }
 0x237   :  { %v283_v19 = vadd.f32 %v259_v12, %v3127_v10  ;;  %v289_v28 = vadd.f32 %v265_v41, %v3129_v51  ;;  %v751_v11 = vadd.f32 %v727_v60, %v658_v3  ;;  %v3135_v5 = vunpack.c.h.bf16 %v3134_v44  ;;  %v3144_v41 = vld [vmem:[#allocation32_spill] sm:$0xff] }
 0x238   :  { %v538_v40 = vmul.f32 %v2513_v59, %v3131_v2  ;;  %v544_v57 = vmul.f32 %v2513_v59, %v3133_v29  ;;  %v3137_v1 = vunpack.c.h.bf16 %v3136_v23  ;;  %v3139_v24 = vunpack.c.h.bf16 %v3138_v62 }
 0x239   :  { %v631_v46 = vmul.f32 %v3102_v26, %v3135_v5  ;;  %v376_v13 = vadd.f32 %v352_v54, %v283_v19  ;;  %v382_v53 = vadd.f32 %v358_v8, %v289_v28  ;;  %v3141_v52 = vunpack.c.h.bf16 %v3140_v30 }
 0x23a   :  { %v637_v33 = vmul.f32 %v3102_v26, %v3137_v1  ;;  %v724_v31 = vmul.f32 %v2557_v49, %v3139_v24  ;;  %v838_v47 = vadd.f32 %v814_v6, %v745_v37  ;;  %v844_v60 = vadd.f32 %v820_v9, %v751_v11 }
 0x23b   :  { %v730_v34 = vmul.f32 %v2557_v49, %v3141_v52  ;;  %v3143_v12 = vunpack.c.h.bf16 %v3142_v56  ;;  %v3145_v42 = vunpack.c.h.bf16 %v3144_v41  ;;  %v469_v54 = vadd.f32 %v445_v21, %v376_v13 }
 0x23c   :  { %v475_v8 = vadd.f32 %v451_v35, %v382_v53  ;;  %v3147_v3 = vunpack.c.h.bf16 %v3146_v7  ;;  %v916_v36 = vmul.f32 %v2511_v15, %v884_v43  ;;  %v931_v10 = vadd.f32 %v907_v45, %v838_v47 }
 0x23d   :  { %v817_v32 = vmul.f32 %v2583_v50, %v3143_v12  ;;  %v823_v63 = vmul.f32 %v2583_v50, %v3145_v42  ;;  %v937_v19 = vadd.f32 %v913_v55, %v844_v60  ;;  %v3148_v6 = vunpack.c.l.bf16 %v3114_v39 }
 0x23e   :  { %v910_v0 = vmul.f32 %v2511_v15, %v3147_v3  ;;  %v3149_v51 = vunpack.c.l.bf16 %v3116_v61  ;;  %v562_v2 = vadd.f32 %v538_v40, %v469_v54  ;;  %v568_v29 = vadd.f32 %v544_v57, %v475_v8 }
 0x23f   :  { %v258_v9 = vmul.f32 %v2429_v58, %v3148_v6  ;;  %v3150_v21 = vunpack.c.l.bf16 %v3118_v16  ;;  %v3151_v37 = vunpack.c.l.bf16 %v3120_v20  ;;  %v949_v45 = vpack.c.bf16 %v937_v19, %v931_v10 }
 0x240   :  { %v264_v28 = vmul.f32 %v2429_v58, %v3149_v51  ;;  %v3152_v55 = vunpack.c.l.bf16 %v3126_v48  ;;  %v3153_v11 = vunpack.c.l.bf16 %v3128_v27  ;;  %v3154_v61 = vunpack.c.l.bf16 %v3122_v14 }
 0x241   :  { %v351_v35 = vmul.f32 %v2427_v22, %v3150_v21  ;;  %v357_v43 = vmul.f32 %v2427_v22, %v3151_v37  ;;  %v655_v40 = vadd.f32 %v631_v46, %v562_v2  ;;  %v661_v57 = vadd.f32 %v637_v33, %v568_v29  ;;  %1159 = vmatpush1.bf16.msra.mxu0 %v949_v45 }
 0x242   :  { %v282_v39 = vadd.f32 %v258_v9, %v3152_v55  ;;  %v288_v5 = vadd.f32 %v264_v28, %v3153_v11  ;;  %v444_v58 = vmul.f32 %v2481_v18, %v3154_v61  ;;  %v3155_v16 = vunpack.c.l.bf16 %v3124_v25 }
 0x243   :  { %v3156_v20 = vunpack.c.l.bf16 %v3130_v38  ;;  %v3157_v27 = vunpack.c.l.bf16 %v3132_v4  ;;  %v3158_v14 = vunpack.c.l.bf16 %v3134_v44  ;;  %v748_v33 = vadd.f32 %v724_v31, %v655_v40 }
 0x244   :  { %v450_v1 = vmul.f32 %v2481_v18, %v3155_v16  ;;  %v375_v48 = vadd.f32 %v351_v35, %v282_v39  ;;  %v381_v13 = vadd.f32 %v357_v43, %v288_v5  ;;  %v754_v24 = vadd.f32 %v730_v34, %v661_v57 }
 0x245   :  { %v537_v22 = vmul.f32 %v2513_v59, %v3156_v20  ;;  %v543_v53 = vmul.f32 %v2513_v59, %v3157_v27  ;;  %v630_v46 = vmul.f32 %v3102_v26, %v3158_v14  ;;  %v3159_v25 = vunpack.c.l.bf16 %v3136_v23  ;;  %v1340_v20 = vld [vmem:[%s2791_s5] sm:$0xff]  ;;  %v1341_v14 = vld [vmem:[%s2791_s5 + $0x8] sm:$0xff] }
 0x246   :  { %v3160_v38 = vunpack.c.l.bf16 %v3138_v62  ;;  %v468_v47 = vadd.f32 %v444_v58, %v375_v48  ;;  %v474_v60 = vadd.f32 %v450_v1, %v381_v13  ;;  %v3161_v4 = vunpack.c.l.bf16 %v3140_v30  ;;  %v3167_v48 = vld [vmem:[#allocation22_spill] sm:$0xff] }
 0x247   :  { %v636_v18 = vmul.f32 %v3102_v26, %v3159_v25  ;;  %v3162_v44 = vunpack.c.l.bf16 %v3142_v56  ;;  %v841_v31 = vadd.f32 %v817_v32, %v748_v33  ;;  %v847_v34 = vadd.f32 %v823_v63, %v754_v24  ;;  %v1342_v33 = vld [vmem:[%s2791_s5 + $0x18] sm:$0xff] }
 0x248   :  { %v723_v52 = vmul.f32 %v2557_v49, %v3160_v38  ;;  %v729_v59 = vmul.f32 %v2557_v49, %v3161_v4  ;;  %v3163_v23 = vunpack.c.l.bf16 %v3144_v41  ;;  %v3164_v62 = vunpack.c.l.bf16 %v3146_v7  ;;  %v1343_v38 = vld [vmem:[%s2791_s5 + $0x30] sm:$0xff] }
 0x249   :  { %v816_v12 = vmul.f32 %v2583_v50, %v3162_v44  ;;  %v561_v54 = vadd.f32 %v537_v22, %v468_v47  ;;  %v567_v8 = vadd.f32 %v543_v53, %v474_v60  ;;  %v3165_v30 = vunpack.c.l.bf16 %v3105_v17  ;;  %v3168_v47 = vld [vmem:[#allocation8_spill] sm:$0xff]  ;;  %v1344_v44 = vld [vmem:[%s2791_s5 + $0x38] sm:$0xff] }
 0x24a   :  { %v822_v26 = vmul.f32 %v2583_v50, %v3163_v23  ;;  %v909_v42 = vmul.f32 %v2511_v15, %v3164_v62  ;;  %v934_v3 = vadd.f32 %v910_v0, %v841_v31  ;;  %v940_v56 = vadd.f32 %v916_v36, %v847_v34  ;;  %v1345_v31 = vld [vmem:[%s2791_s5 + $0x48] sm:$0xff]  ;;  %s1366_s5 = scalar_lea.vmem %s1260_s22, 1536 }
 0x24b   :  { %v915_v49 = vmul.f32 %v2511_v15, %v3165_v30  ;;  %v654_v10 = vadd.f32 %v630_v46, %v561_v54  ;;  %v660_v19 = vadd.f32 %v636_v18, %v567_v8  ;;  %v3166_v57 = vmov 0   ;;  %v3170_v54 = vld [vmem:[#allocation15_spill] sm:$0xff]  ;;  %p1367_p5 = scmp.ne.s32.totalorder %s1260_s22, %s1366_s5  ;;  %p1372_p7 = scmp.lt.s32.totalorder %s1366_s5, %s1366_s5 }
 0x24c   :  { %v952_v32 = vpack.c.bf16 %v940_v56, %v934_v3 }
 0x24d   :  { %v747_v63 = vadd.f32 %v723_v52, %v654_v10  ;;  %v753_v6 = vadd.f32 %v729_v59, %v660_v19  ;;  %v3172_v10 = vld [vmem:[#allocation16_spill] sm:$0xff]  ;;  %p1373_p8 = por %p1372_p7, %p1371_p6 }
 0x24e   :  { %1201 = vmatprep.subr.bf16.mxu1 %v952_v32 }
 0x24f   :  { %v840_v41 = vadd.f32 %v816_v12, %v747_v63  ;;  %v846_v50 = vadd.f32 %v822_v26, %v753_v6  ;;  %v3169_v26 = vld [vmem:[#allocation9_spill] sm:$0xff]  ;;  %p1374_p9 = pnand %p1373_p8, %p1367_p5 }
 0x251   :  { %v933_v9 = vadd.f32 %v909_v42, %v840_v41  ;;  %v939_v7 = vadd.f32 %v915_v49, %v846_v50  ;;  %v3171_v49 = vld [vmem:[#allocation10_spill] sm:$0xff] }
 0x253   :  { %v951_v51 = vpack.c.bf16 %v939_v7, %v933_v9 }
 0x26a   :  { %v1005_v28 = vpop.f32.mrf.mxu1 }
 0x26c   :  { %v1007_v2 = vpop.f32.mrf.mxu1 }
 0x26e   :  { %v1008_v29 = vpop.f32.mrf.mxu1 }
 0x270   :  { %v1010_v21 = vpop.f32.mrf.mxu1 }
 0x27d   :  { %v1046_v17 = vpop.f32.mrf.mxu1 }
 0x27e   :  { %v1047_v37 = vadd.f32 %v1046_v17, %v1005_v28 }
 0x27f   :  { %v1048_v35 = vpop.f32.mrf.mxu1 }
 0x281   :  { %v1049_v15 = vpop.f32.mrf.mxu1 }
 0x282   :  { %v1050_v45 = vadd.f32 %v1049_v15, %v1008_v29 }
 0x283   :  { %v1051_v0 = vpop.f32.mrf.mxu1 }
 0x290   :  { %v1087_v36 = vpop.f32.mrf.mxu1 }
 0x291   :  { %v1088_v55 = vadd.f32 %v1087_v36, %v1047_v37 }
 0x292   :  { %v1089_v43 = vpop.f32.mrf.mxu1 }
 0x293   :  { %v1094_v61 = vmax.f32 %v1088_v55, 0.0 }
 0x294   :  { %v1090_v39 = vpop.f32.mrf.mxu1 }
 0x295   :  { %v1091_v11 = vadd.f32 %v1090_v39, %v1050_v45 }
 0x296   :  { %v1092_v5 = vpop.f32.mrf.mxu1 }
 0x297   :  { %v1095_v58 = vmax.f32 %v1091_v11, 0.0 }
 0x299   :  { %v1096_v40 = vpack.c.bf16 %v1095_v58, %v1094_v61 }
 0x29b   :  { %1271 = vmatmul.mubr.msk.bf16.vlgmr.msra.gmra.mxu1 %vm1097_vm0, %v1096_v40  ;;  %1272 = vmatmul.mubr.msk.bf16.vlgmr.msra.gmra.mxu0 %vm1097_vm0, %v1096_v40 }
 0x29c   :  { %1202 = vmatpush1.bf16.msra.mxu1 %v951_v51  ;;  %1219 = vmatprep.mubr.bf16.mxu1 %v3166_v57 }
 0x2a3   :  { %1273 = vmatmul.mubr.msk.bf16.vlgmr.msra.gmra.mxu1 %vm1097_vm0, %v1096_v40 }
 0x35b   :  { %v1135_v16 = vpop.f32.mrf.mxu1  ;;  %v1178_v1 = vpop.f32.mrf.mxu0 }
 0x35c   :  { %v1230_v22 = vadd.f32 %v1340_v20, %v1135_v16  ;;  %v1232_v13 = vadd.f32 %v1178_v1, %v3167_v48 }
 0x35d   :  { %v1137_v27 = vpop.f32.mrf.mxu1  ;;  %v1180_v53 = vpop.f32.mrf.mxu0 }
 0x35e   :  { %1242 = vst [vmem:[#allocation5] sm:$0xff] %v1230_v22  ;;  %1244 = vst [vmem:[#allocation5 + $0x10] sm:$0xff] %v1232_v13  ;;  %v1231_v46 = vadd.f32 %v1341_v14, %v1137_v27  ;;  %v1233_v24 = vadd.f32 %v1342_v33, %v1180_v53 }
 0x35f   :  { %v1139_v25 = vpop.f32.mrf.mxu1  ;;  %v1182_v18 = vpop.f32.mrf.mxu0 }
 0x360   :  { %1243 = vst [vmem:[#allocation5 + $0x8] sm:$0xff] %v1231_v46  ;;  %1245 = vst [vmem:[#allocation5 + $0x18] sm:$0xff] %v1233_v24  ;;  %v1236_v52 = vadd.f32 %v1343_v38, %v1139_v25  ;;  %v1238_v60 = vadd.f32 %v1182_v18, %v3168_v47 }
 0x361   :  { %v1141_v4 = vpop.f32.mrf.mxu1  ;;  %v1184_v59 = vpop.f32.mrf.mxu0 }
 0x362   :  { %1248 = vst [vmem:[#allocation5 + $0x30] sm:$0xff] %v1236_v52  ;;  %1250 = vst [vmem:[#allocation5 + $0x40] sm:$0xff] %v1238_v60  ;;  %v1237_v12 = vadd.f32 %v1344_v44, %v1141_v4  ;;  %v1239_v34 = vadd.f32 %v1345_v31, %v1184_v59 }
 0x363   :  { %v1221_v23 = vpop.f32.mrf.mxu1 }
 0x364   :  { %1249 = vst [vmem:[#allocation5 + $0x38] sm:$0xff] %v1237_v12  ;;  %1251 = vst [vmem:[#allocation5 + $0x48] sm:$0xff] %v1239_v34  ;;  %v1234_v62 = vadd.f32 %v1221_v23, %v3169_v26 }
 0x365   :  { %v1223_v42 = vpop.f32.mrf.mxu1 }
 0x366   :  { %1246 = vst [vmem:[#allocation5 + $0x20] sm:$0xff] %v1234_v62  ;;  %v1235_v8 = vadd.f32 %v1223_v42, %v3170_v54 }
 0x367   :  { %v1225_v30 = vpop.f32.mrf.mxu1 }
 0x368   :  { %1247 = vst [vmem:[#allocation5 + $0x28] sm:$0xff] %v1235_v8  ;;  %v1240_v3 = vadd.f32 %v1225_v30, %v3171_v49 }
 0x369   :  { %v1227_v56 = vpop.f32.mrf.mxu1 }
 0x36a   :  { %1252 = vst [vmem:[#allocation5 + $0x50] sm:$0xff] %v1240_v3  ;;  %v1241_v19 = vadd.f32 %v1227_v56, %v3172_v10 }
 0x36c   :  { %1253 = vst [vmem:[#allocation5 + $0x58] sm:$0xff] %v1241_v19 }
 0x36d   :  { %1377 = shalt.err (!%p1374_p9)
}
 0x36e   :  { %s1403_s23 = smov 768   ;;  %s1404_s24 = smov 48  }
 0x36f   :  { %1265 = dma.vmem_to_hbm [thread:$0]  %s1260_s22, 1536, %s2792_s6, [#allocation4], %s1403_s23, %s1403_s23, %s1404_s24  }
 0x370   :  { %1388 = dma.done.wait [#allocation4], 1536  }
 0x371   :  { %1389 = vsyncadd [#allocation4], 4294965760 }
 0x372   :  { %1269 = vsyncpa [#allocation3], 1 }
 0x373   :  { %1270 = vsyncpa [#allocation4], 1 }

</bundles_post_ra>
